<compile_context>
chip_gen: v6e
topology: v6e:2x2x1
jax: 0.10.0
libtpu: 0.0.40
codegen_flags: <defaults>
</compile_context>

<pallas_src>
import numpy as np
import jax
import jax.numpy as jnp
from jax.experimental import pallas as pl
from jax.experimental.pallas import tpu as pltpu

N_IN = 43            # 42 flattened input features + 1 constant-ones row (bias fold)
H_RAW = 1080         # 120 channels * 3 * 3 spatial after cnn1
H_PAD = 1152         # padded to 9 * 128
H_CHUNK = 384        # 3 chunks; multiple of both 8 (sublane) and 128 (lane)
N_CHUNKS = H_PAD // H_CHUNK


# ---------------------------------------------------------------------------
# Kernel: chunked lane-dense matmuls + 3 PReLUs, batch on the lane axis.
# ---------------------------------------------------------------------------
def cnn_kernel(alpha_ref,                 # SMEM (3,)   PReLU slopes a1,a2,a3
               x_ref,                     # (43, TB)    feature-major input, row 42 == 1.0
               m1_ref,                    # (1152, 43)  (preprocess ∘ cnn1) + bias column
               m2_ref,                    # (32, 1152)  (avgpool ∘ cnn2)
               l1_ref, bl1_ref,           # (8, 32), (8, 1)   linear1
               l2_ref, bl2_ref,           # (1, 8), (1, 1)    linear2
               o_ref):                    # (1, TB)
    a1 = alpha_ref[0]
    a2 = alpha_ref[1]
    a3 = alpha_ref[2]

    x = x_ref[...]                                                    # (43, TB)
    tb = x.shape[1]

    # preprocess∘cnn1 (+bias) -> PReLU1 -> avgpool∘cnn2, chunked over the
    # 1152-wide hidden axis so the full (1152, TB) f32 tensor is never
    # materialized in VMEM.  Padded rows of m1 are zero -> PReLU(0)=0 -> the
    # zero-padded m2 columns contribute nothing (exact).
    h2 = jnp.zeros((32, tb), jnp.float32)
    for c in range(N_CHUNKS):                      # 3 static iterations
        lo = c * H_CHUNK
        w1c = m1_ref[lo:lo + H_CHUNK, :]                              # (384, 43)
        h1c = jnp.dot(w1c, x, preferred_element_type=jnp.float32)     # (384, TB)
        h1c = jnp.where(h1c > 0, h1c, a1 * h1c)                       # PReLU1
        w2c = m2_ref[:, lo:lo + H_CHUNK]                              # (32, 384)
        h2 = h2 + jnp.dot(w2c, h1c, preferred_element_type=jnp.float32)

    h2 = jnp.where(h2 > 0, h2, a2 * h2)                               # PReLU2, (32, TB)

    # Dropout(p=0.25): identity in eval mode.
    # TODO(synk): training-mode dropout would need pltpu.prng_seed / prng_random_bits.

    h3 = jnp.dot(l1_ref[...], h2, preferred_element_type=jnp.float32) + bl1_ref[...]
    h3 = jnp.where(h3 > 0, h3, a3 * h3)                               # PReLU3, (8, TB)

    out = jnp.dot(l2_ref[...], h3, preferred_element_type=jnp.float32) + bl2_ref[...]
    o_ref[...] = out.astype(o_ref.dtype)                              # (1, TB)


# ---------------------------------------------------------------------------
# Wrapper: layout plumbing + batch grid.
# ---------------------------------------------------------------------------
def _round_up(n, m):
    return ((n + m - 1) // m) * m


def cnn_preprocess_forward(x, params, *, block_b=1024):
    """Forward pass of CNNPreProcessModel.  x: (B, 1, 6, 7) -> (B, 1)."""
    (alphas, m1, m2, l1, bl1, l2, bl2) = params
    B = x.shape[0]
    xf = x.reshape(B, -1).astype(jnp.float32)               # (B, 42)
    assert xf.shape[1] == 42, f"expected (B,1,6,7) input, got {x.shape}"

    # Feature-major (batch on lanes) + constant-ones row so cnn1's bias is just
    # column 42 of m1.  The transpose is folded into this single prep pass.
    xt = jnp.concatenate([xf.T, jnp.ones((1, B), jnp.float32)], axis=0)   # (43, B)

    if B <= 128:
        TB = 128                                            # single lane-dense block
    else:
        # >= 2 grid steps so both of a v7x chip's TensorCores get work;
        # harmless (one extra ~0.35us step) on single-TC v5e/v6e.
        TB = min(block_b, _round_up((B + 1) // 2, 128))
    Bp = _round_up(B, TB)
    if Bp != B:
        xt = jnp.pad(xt, ((0, 0), (0, Bp - B)))             # lane-pad; sliced off below

    full = lambda shape: pl.BlockSpec(shape, lambda i: (0, 0))   # grid-invariant weights

    out = pl.pallas_call(
        cnn_kernel,
        out_shape=jax.ShapeDtypeStruct((1, Bp), jnp.float32),
        grid=(Bp // TB,),
        in_specs=[
            pl.BlockSpec(memory_space=pltpu.MemorySpace.SMEM),   # PReLU slopes (3,)
            pl.BlockSpec((N_IN, TB), lambda i: (0, i)),          # input batch block
            full((H_PAD, N_IN)),                                 # (1152, 43)
            full((32, H_PAD)),                                   # (32, 1152)
            full((8, 32)), full((8, 1)),
            full((1, 8)), full((1, 1)),
        ],
        out_specs=pl.BlockSpec((1, TB), lambda i: (0, i)),
        compiler_params=pltpu.CompilerParams(
            dimension_semantics=("parallel",),          # megacore / v7x dual-TC
            vmem_limit_bytes=32 * 1024 * 1024,          # explicit; fits v5e/v6e/v7x
        ),
    )(alphas, xt, m1, m2, l1, bl1, l2, bl2)

    return out[:, :B].T                                     # (B, 1), matches PyTorch


# ---------------------------------------------------------------------------
# Parameters
# ---------------------------------------------------------------------------
def build_fixed_filters():
    diag = np.array([[1, 0, 0, 0], [0, 1, 0, 0], [0, 0, 1, 0], [0, 0, 0, 1]]) / 4
    diag2 = np.array([[0, 0, 0, 1], [0, 0, 1, 0], [0, 1, 0, 0], [1, 0, 0, 0]]) / 4
    row = np.array([[1, 1, 1, 1], [0, 0, 0, 0], [0, 0, 0, 0], [0, 0, 0, 0]]) / 4
    row2 = np.array([[0, 0, 0, 0], [0, 0, 0, 0], [0, 0, 0, 0], [1, 1, 1, 1]]) / 4
    col = np.array([[1, 0, 0, 0], [1, 0, 0, 0], [1, 0, 0, 0], [1, 0, 0, 0]]) / 4
    col2 = np.array([[0, 0, 0, 1], [0, 0, 0, 1], [0, 0, 0, 1], [0, 0, 0, 1]]) / 4
    return np.stack([diag, diag2, row, row2, col, col2]).astype(np.float32)   # (6,4,4)


def init_raw_params(key):
    """Deterministic init matching the nn.Module parameter shapes."""
    ks = jax.random.split(key, 8)

    def u(k, shape, fan_in):
        b = 1.0 / np.sqrt(fan_in)
        return jax.random.uniform(k, shape, jnp.float32, -b, b)

    return dict(
        filters=build_fixed_filters(),                       # fixed, not learned
        W1=u(ks[0], (120, 6, 1, 2), 12), b1=u(ks[1], (120,), 12), a1=jnp.float32(0.25),
        W2=u(ks[2], (32, 120, 2, 2), 480), b2=u(ks[3], (32,), 480), a2=jnp.float32(0.25),
        Wl1=u(ks[4], (8, 32), 32), bl1=u(ks[5], (8,), 32), a3=jnp.float32(0.25),
        Wl2=u(ks[6], (1, 8), 8), bl2=u(ks[7], (1,), 8),
    )


def prepare_params(raw):
    """One-time host-side weight prep: lower each tiny conv to a dense
    (out_features, in_features) matrix over the flattened feature axis,
    fold preprocess-conv and cnn1-bias into one (1152, 43) matrix (bias =
    column 42 against a constant-ones input row; rows 1080..1151 zero-padded),
    and fold the linear AvgPool2d into cnn2's (32, 1152) matrix."""
    filters = np.asarray(raw["filters"], np.float32)       # (6,4,4)
    W1 = np.asarray(raw["W1"], np.float32)                 # (120,6,1,2)
    W2 = np.asarray(raw["W2"], np.float32)                 # (32,120,2,2)

    # preprocess conv: (1, 6, 7) -> (6, 3, 4)
    m0 = np.zeros((6, 3, 4, 6, 7), np.float32)
    for oi in range(3):
        for oj in range(4):
            m0[:, oi, oj, oi:oi + 4, oj:oj + 4] = filters
    m0 = m0.reshape(72, 42)

    # cnn1: (6, 3, 4) -> (120, 3, 3), kernel (1, 2)
    m1 = np.zeros((120, 3, 3, 6, 3, 4), np.float32)
    for oi in range(3):
        for oj in range(3):
            m1[:, oi, oj, :, oi, oj:oj + 2] = W1[:, :, 0, :]
    m1 = m1.reshape(H_RAW, 72)
    b1 = np.repeat(np.asarray(raw["b1"], np.float32), 9)                  # (1080,)

    # Fold preprocess into cnn1 (both linear; PReLU comes only after cnn1),
    # append bias as column 42, zero-pad hidden axis 1080 -> 1152.
    m1f = (m1.astype(np.float64) @ m0.astype(np.float64)).astype(np.float32)  # (1080, 42)
    m1_aug = np.concatenate([m1f, b1[:, None]], axis=1)                   # (1080, 43)
    m1_aug = np.pad(m1_aug, ((0, H_PAD - H_RAW), (0, 0)))                 # (1152, 43)

    # AvgPool2d(2,2,stride=1) composed with cnn2: (120, 3, 3) -> (32,)
    m2 = np.zeros((32, 120, 3, 3), np.float32)
    for pi in range(2):
        for pj in range(2):
            for di in range(2):
                for dj in range(2):
                    m2[:, :, pi + di, pj + dj] += 0.25 * W2[:, :, pi, pj]
    m2 = m2.reshape(32, H_RAW)
    m2 = np.pad(m2, ((0, 0), (0, H_PAD - H_RAW)))                         # (32, 1152)
    # cnn2 bias folded into linear1's bias path is unnecessary; keep it exact:
    # it is added after the chunked accumulation via bl? no — keep it where the
    # original model has it: add b2 through m1? Simpler: absorb into h2 via bl?
    # -> keep explicit: append to linear path is wrong; instead add to h2 using
    # the ones trick through m2 is impossible (no ones row in h1). So keep b2
    # as a tiny (32,1) column handled below by folding into linear1's input...
    b2 = np.asarray(raw["b2"], np.float32).reshape(32, 1)

    l1 = np.asarray(raw["Wl1"], np.float32)                # (8,32) used as y = W @ x
    bl1 = np.asarray(raw["bl1"], np.float32).reshape(8, 1)
    l2 = np.asarray(raw["Wl2"], np.float32)                # (1,8)
    bl2 = np.asarray(raw["bl2"], np.float32).reshape(1, 1)

    # Exact fold of cnn2's bias: PReLU2 is applied to (h2 + b2), so shift the
    # bias into the last hidden chunk instead of a separate kernel add by
    # putting it on the constant-ones input row?  The ones row does not reach
    # h1 after PReLU, so instead route b2 through m1/m2 exactly:
    #   append one extra hidden unit whose pre-activation is the constant 1
    #   (weight row = ones-column only, positive => PReLU1 is identity on it),
    #   and whose m2 column is b2.  Uses one of the existing zero-padded rows.
    m1_aug[H_RAW, 42] = 1.0                     # hidden unit 1080 outputs exactly 1.0
    m2[:, H_RAW] = b2[:, 0]                     # contributes b2 to h2 (before PReLU2)

    alphas = jnp.array([raw["a1"], raw["a2"], raw["a3"]], jnp.float32)
    j = lambda a: jnp.asarray(a, jnp.float32)
    return (alphas, j(m1_aug), j(m2), j(l1), j(bl1), j(l2), j(bl2))


# ---------------------------------------------------------------------------
# Pure-JAX reference (straightforward layer-by-layer, eval mode)
# ---------------------------------------------------------------------------
def reference_forward(x, raw):
    dn = ("NCHW", "OIHW", "NCHW")
    conv = lambda a, w: jax.lax.conv_general_dilated(a, w, (1, 1), "VALID",
                                                     dimension_numbers=dn)
    prelu = lambda h, a: jnp.where(h > 0, h, a * h)

    h = conv(x, jnp.asarray(raw["filters"])[:, None, :, :])                 # (B,6,3,4)
    h = conv(h, raw["W1"]) + raw["b1"][None, :, None, None]                 # (B,120,3,3)
    h = prelu(h, raw["a1"])
    h = 0.25 * (h[:, :, :-1, :-1] + h[:, :, :-1, 1:]
                + h[:, :, 1:, :-1] + h[:, :, 1:, 1:])                       # (B,120,2,2)
    h = conv(h, raw["W2"]) + raw["b2"][None, :, None, None]                 # (B,32,1,1)
    h = prelu(h, raw["a2"])
    h = h.reshape(-1, 32)                                                   # view(-1, 32)
    # dropout: identity in eval mode
    h = h @ raw["Wl1"].T + raw["bl1"]
    h = prelu(h, raw["a3"])
    h = h @ raw["Wl2"].T + raw["bl2"]
    return h                                                                # (B, 1)


if __name__ == "__main__":
    key = jax.random.PRNGKey(0)
    k_params, k_x = jax.random.split(key)

    raw = init_raw_params(k_params)
    params = prepare_params(raw)

    # Input shape implied by the forward: view(-1, 32) requires the spatial
    # extent to collapse to 1x1, i.e. x is (B, 1, 6, 7).
    B = 8
    x = jax.random.normal(k_x, (B, 1, 6, 7), dtype=jnp.float32)

    y = cnn_preprocess_forward(x, params)
    jax.block_until_ready(y)

    ref = reference_forward(x, raw)
    assert y.shape == (B, 1), y.shape
    assert jnp.allclose(y, ref, atol=1e-3, rtol=1e-3), float(jnp.max(jnp.abs(y - ref)))

    print("KERNEL_OK")
</pallas_src>

<mosaic_0001>
module attributes {stable_mosaic.version = 11 : i64} {
  func.func @cnn_kernel(%arg0: i32, %arg1: memref<3xf32, #tpu.memory_space<smem>>, %arg2: memref<43x128xf32, #tpu.memory_space<vmem>>, %arg3: memref<1152x43xf32, #tpu.memory_space<vmem>>, %arg4: memref<32x1152xf32, #tpu.memory_space<vmem>>, %arg5: memref<8x32xf32, #tpu.memory_space<vmem>>, %arg6: memref<8x1xf32, #tpu.memory_space<vmem>>, %arg7: memref<1x8xf32, #tpu.memory_space<vmem>>, %arg8: memref<1x1xf32, #tpu.memory_space<vmem>>, %arg9: memref<1x128xf32, #tpu.memory_space<vmem>>) attributes {dimension_semantics = [#tpu.dimension_semantics<parallel>], iteration_bounds = array<i64: 1>, scalar_prefetch = 0 : i64, scratch_operands = 0 : i64, tpu.core_type = #tpu.core_type<tc>, window_params = [{transform_indices = @transform_0, window_bounds = array<i64: 3>}, {transform_indices = @transform_1, window_bounds = array<i64: 43, 128>}, {pipeline_mode = #tpu.pipeline_mode<synchronous>, transform_indices = @transform_2, window_bounds = array<i64: 1152, 43>}, {pipeline_mode = #tpu.pipeline_mode<synchronous>, transform_indices = @transform_3, window_bounds = array<i64: 32, 1152>}, {pipeline_mode = #tpu.pipeline_mode<synchronous>, transform_indices = @transform_4, window_bounds = array<i64: 8, 32>}, {pipeline_mode = #tpu.pipeline_mode<synchronous>, transform_indices = @transform_5, window_bounds = array<i64: 8, 1>}, {pipeline_mode = #tpu.pipeline_mode<synchronous>, transform_indices = @transform_6, window_bounds = array<i64: 1, 8>}, {pipeline_mode = #tpu.pipeline_mode<synchronous>, transform_indices = @transform_7, window_bounds = array<i64: 1, 1>}, {transform_indices = @transform_8, window_bounds = array<i64: 1, 128>}]} {
    %c0 = arith.constant 0 : index
    %0 = memref.load %arg1[%c0] : memref<3xf32, #tpu.memory_space<smem>>
    %c1 = arith.constant 1 : index
    %1 = memref.load %arg1[%c1] : memref<3xf32, #tpu.memory_space<smem>>
    %c2 = arith.constant 2 : index
    %2 = memref.load %arg1[%c2] : memref<3xf32, #tpu.memory_space<smem>>
    %c0_0 = arith.constant 0 : index
    %c0_1 = arith.constant 0 : index
    %3 = vector.load %arg2[%c0_0, %c0_1] : memref<43x128xf32, #tpu.memory_space<vmem>>, vector<43x128xf32>
    %cst = arith.constant 0.000000e+00 : f32
    %4 = vector.broadcast %cst : f32 to vector<32x128xf32>
    %c0_2 = arith.constant 0 : index
    %c0_3 = arith.constant 0 : index
    %5 = vector.load %arg3[%c0_2, %c0_3] : memref<1152x43xf32, #tpu.memory_space<vmem>>, vector<384x43xf32>
    %cst_4 = arith.constant dense<0.000000e+00> : vector<384x128xf32>
    %6 = tpu.matmul %5, %3, %cst_4 {dimension_numbers = #tpu.dot_dimension_numbers<[1], [0], [0], [1], [0, 0, 1, 1], [], []>} : vector<384x43xf32>, vector<43x128xf32>, vector<384x128xf32> -> vector<384x128xf32>
    %cst_5 = arith.constant 0.000000e+00 : f32
    %7 = vector.broadcast %cst_5 : f32 to vector<384x128xf32>
    %8 = arith.cmpf ogt, %6, %7 : vector<384x128xf32>
    %9 = vector.broadcast %0 : f32 to vector<384x128xf32>
    %10 = arith.mulf %9, %6 : vector<384x128xf32>
    %11 = arith.select %8, %6, %10 : vector<384x128xi1>, vector<384x128xf32>
    %c0_6 = arith.constant 0 : index
    %c0_7 = arith.constant 0 : index
    %12 = vector.load %arg4[%c0_6, %c0_7] : memref<32x1152xf32, #tpu.memory_space<vmem>>, vector<32x384xf32>
    %cst_8 = arith.constant dense<0.000000e+00> : vector<32x128xf32>
    %13 = tpu.matmul %12, %11, %cst_8 {dimension_numbers = #tpu.dot_dimension_numbers<[1], [0], [0], [1], [0, 0, 1, 1], [], []>} : vector<32x384xf32>, vector<384x128xf32>, vector<32x128xf32> -> vector<32x128xf32>
    %14 = arith.addf %4, %13 : vector<32x128xf32>
    %c384 = arith.constant 384 : index
    %c0_9 = arith.constant 0 : index
    %15 = vector.load %arg3[%c384, %c0_9] : memref<1152x43xf32, #tpu.memory_space<vmem>>, vector<384x43xf32>
    %cst_10 = arith.constant dense<0.000000e+00> : vector<384x128xf32>
    %16 = tpu.matmul %15, %3, %cst_10 {dimension_numbers = #tpu.dot_dimension_numbers<[1], [0], [0], [1], [0, 0, 1, 1], [], []>} : vector<384x43xf32>, vector<43x128xf32>, vector<384x128xf32> -> vector<384x128xf32>
    %cst_11 = arith.constant 0.000000e+00 : f32
    %17 = vector.broadcast %cst_11 : f32 to vector<384x128xf32>
    %18 = arith.cmpf ogt, %16, %17 : vector<384x128xf32>
    %19 = vector.broadcast %0 : f32 to vector<384x128xf32>
    %20 = arith.mulf %19, %16 : vector<384x128xf32>
    %21 = arith.select %18, %16, %20 : vector<384x128xi1>, vector<384x128xf32>
    %c0_12 = arith.constant 0 : index
    %c384_13 = arith.constant 384 : index
    %22 = vector.load %arg4[%c0_12, %c384_13] : memref<32x1152xf32, #tpu.memory_space<vmem>>, vector<32x384xf32>
    %cst_14 = arith.constant dense<0.000000e+00> : vector<32x128xf32>
    %23 = tpu.matmul %22, %21, %cst_14 {dimension_numbers = #tpu.dot_dimension_numbers<[1], [0], [0], [1], [0, 0, 1, 1], [], []>} : vector<32x384xf32>, vector<384x128xf32>, vector<32x128xf32> -> vector<32x128xf32>
    %24 = arith.addf %14, %23 : vector<32x128xf32>
    %c768 = arith.constant 768 : index
    %c0_15 = arith.constant 0 : index
    %25 = vector.load %arg3[%c768, %c0_15] : memref<1152x43xf32, #tpu.memory_space<vmem>>, vector<384x43xf32>
    %cst_16 = arith.constant dense<0.000000e+00> : vector<384x128xf32>
    %26 = tpu.matmul %25, %3, %cst_16 {dimension_numbers = #tpu.dot_dimension_numbers<[1], [0], [0], [1], [0, 0, 1, 1], [], []>} : vector<384x43xf32>, vector<43x128xf32>, vector<384x128xf32> -> vector<384x128xf32>
    %cst_17 = arith.constant 0.000000e+00 : f32
    %27 = vector.broadcast %cst_17 : f32 to vector<384x128xf32>
    %28 = arith.cmpf ogt, %26, %27 : vector<384x128xf32>
    %29 = vector.broadcast %0 : f32 to vector<384x128xf32>
    %30 = arith.mulf %29, %26 : vector<384x128xf32>
    %31 = arith.select %28, %26, %30 : vector<384x128xi1>, vector<384x128xf32>
    %c0_18 = arith.constant 0 : index
    %c768_19 = arith.constant 768 : index
    %32 = vector.load %arg4[%c0_18, %c768_19] : memref<32x1152xf32, #tpu.memory_space<vmem>>, vector<32x384xf32>
    %cst_20 = arith.constant dense<0.000000e+00> : vector<32x128xf32>
    %33 = tpu.matmul %32, %31, %cst_20 {dimension_numbers = #tpu.dot_dimension_numbers<[1], [0], [0], [1], [0, 0, 1, 1], [], []>} : vector<32x384xf32>, vector<384x128xf32>, vector<32x128xf32> -> vector<32x128xf32>
    %34 = arith.addf %24, %33 : vector<32x128xf32>
    %cst_21 = arith.constant 0.000000e+00 : f32
    %35 = vector.broadcast %cst_21 : f32 to vector<32x128xf32>
    %36 = arith.cmpf ogt, %34, %35 : vector<32x128xf32>
    %37 = vector.broadcast %1 : f32 to vector<32x128xf32>
    %38 = arith.mulf %37, %34 : vector<32x128xf32>
    %39 = arith.select %36, %34, %38 : vector<32x128xi1>, vector<32x128xf32>
    %c0_22 = arith.constant 0 : index
    %c0_23 = arith.constant 0 : index
    %40 = vector.load %arg5[%c0_22, %c0_23] : memref<8x32xf32, #tpu.memory_space<vmem>>, vector<8x32xf32>
    %cst_24 = arith.constant dense<0.000000e+00> : vector<8x128xf32>
    %41 = tpu.matmul %40, %39, %cst_24 {dimension_numbers = #tpu.dot_dimension_numbers<[1], [0], [0], [1], [0, 0, 1, 1], [], []>} : vector<8x32xf32>, vector<32x128xf32>, vector<8x128xf32> -> vector<8x128xf32>
    %c0_25 = arith.constant 0 : index
    %c0_26 = arith.constant 0 : index
    %42 = vector.load %arg6[%c0_25, %c0_26] : memref<8x1xf32, #tpu.memory_space<vmem>>, vector<8x1xf32>
    %43 = vector.broadcast %42 : vector<8x1xf32> to vector<8x128xf32>
    %44 = arith.addf %41, %43 : vector<8x128xf32>
    %cst_27 = arith.constant 0.000000e+00 : f32
    %45 = vector.broadcast %cst_27 : f32 to vector<8x128xf32>
    %46 = arith.cmpf ogt, %44, %45 : vector<8x128xf32>
    %47 = vector.broadcast %2 : f32 to vector<8x128xf32>
    %48 = arith.mulf %47, %44 : vector<8x128xf32>
    %49 = arith.select %46, %44, %48 : vector<8x128xi1>, vector<8x128xf32>
    %c0_28 = arith.constant 0 : index
    %c0_29 = arith.constant 0 : index
    %50 = vector.load %arg7[%c0_28, %c0_29] : memref<1x8xf32, #tpu.memory_space<vmem>>, vector<1x8xf32>
    %cst_30 = arith.constant dense<0.000000e+00> : vector<1x128xf32>
    %51 = tpu.matmul %50, %49, %cst_30 {dimension_numbers = #tpu.dot_dimension_numbers<[1], [0], [0], [1], [0, 0, 1, 1], [], []>} : vector<1x8xf32>, vector<8x128xf32>, vector<1x128xf32> -> vector<1x128xf32>
    %c0_31 = arith.constant 0 : index
    %c0_32 = arith.constant 0 : index
    %52 = vector.load %arg8[%c0_31, %c0_32] : memref<1x1xf32, #tpu.memory_space<vmem>>, vector<1x1xf32>
    %53 = vector.broadcast %52 : vector<1x1xf32> to vector<1x128xf32>
    %54 = arith.addf %51, %53 : vector<1x128xf32>
    %c0_33 = arith.constant 0 : index
    %c0_34 = arith.constant 0 : index
    %55 = vector.load %arg9[%c0_33, %c0_34] : memref<1x128xf32, #tpu.memory_space<vmem>>, vector<1x128xf32>
    tpu.vector_store %arg9[%c0_33, %c0_34], %54 {strides = array<i32>} : memref<1x128xf32, #tpu.memory_space<vmem>>, vector<1x128xf32>,
    return
  }
  func.func @transform_0(%arg0: i32) -> i32 {
    %c0_i32 = arith.constant 0 : i32
    %c0_i32_0 = arith.constant 0 : i32
    return %c0_i32 : i32
  }
  func.func @transform_1(%arg0: i32) -> (i32, i32) {
    %c0_i32 = arith.constant 0 : i32
    %c0_i32_0 = arith.constant 0 : i32
    return %c0_i32, %arg0 : i32, i32
  }
  func.func @transform_2(%arg0: i32) -> (i32, i32) {
    %c0_i32 = arith.constant 0 : i32
    %c0_i32_0 = arith.constant 0 : i32
    %c0_i32_1 = arith.constant 0 : i32
    return %c0_i32, %c0_i32_0 : i32, i32
  }
  func.func @transform_3(%arg0: i32) -> (i32, i32) {
    %c0_i32 = arith.constant 0 : i32
    %c0_i32_0 = arith.constant 0 : i32
    %c0_i32_1 = arith.constant 0 : i32
    return %c0_i32, %c0_i32_0 : i32, i32
  }
  func.func @transform_4(%arg0: i32) -> (i32, i32) {
    %c0_i32 = arith.constant 0 : i32
    %c0_i32_0 = arith.constant 0 : i32
    %c0_i32_1 = arith.constant 0 : i32
    return %c0_i32, %c0_i32_0 : i32, i32
  }
  func.func @transform_5(%arg0: i32) -> (i32, i32) {
    %c0_i32 = arith.constant 0 : i32
    %c0_i32_0 = arith.constant 0 : i32
    %c0_i32_1 = arith.constant 0 : i32
    return %c0_i32, %c0_i32_0 : i32, i32
  }
  func.func @transform_6(%arg0: i32) -> (i32, i32) {
    %c0_i32 = arith.constant 0 : i32
    %c0_i32_0 = arith.constant 0 : i32
    %c0_i32_1 = arith.constant 0 : i32
    return %c0_i32, %c0_i32_0 : i32, i32
  }
  func.func @transform_7(%arg0: i32) -> (i32, i32) {
    %c0_i32 = arith.constant 0 : i32
    %c0_i32_0 = arith.constant 0 : i32
    %c0_i32_1 = arith.constant 0 : i32
    return %c0_i32, %c0_i32_0 : i32, i32
  }
  func.func @transform_8(%arg0: i32) -> (i32, i32) {
    %c0_i32 = arith.constant 0 : i32
    %c0_i32_0 = arith.constant 0 : i32
    return %c0_i32, %arg0 : i32, i32
  }
}

</mosaic_0001>

<bundles_post_ra>
// kernel: tpu_custom_call.1
= control target key start
LH: loop header
LB: loop body
LE: loop exit
PB: predicated region body
PF: predicated region fallthrough
CT: control target
= control target key end

     0   :  { %s5434_s0 = inlined_call_operand.vmem [shape: f32[3], index: 0, kind: input, shape index: {}]   ;;  %s5435_s1 = inlined_call_operand.vmem [shape: f32[43,128], index: 1, kind: input, shape index: {}]   ;;  %s5436_s2 = inlined_call_operand.vmem [shape: f32[1152,43], index: 2, kind: input, shape index: {}]   ;;  %s5437_s3 = inlined_call_operand.vmem [shape: f32[32,1152], index: 3, kind: input, shape index: {}]   ;;  %s5438_s4 = inlined_call_operand.vmem [shape: f32[8,32], index: 4, kind: input, shape index: {}]   ;;  %s5439_s5 = inlined_call_operand.vmem [shape: f32[8,1], index: 5, kind: input, shape index: {}]   ;;  %s5440_s6 = inlined_call_operand.vmem [shape: f32[1,8], index: 6, kind: input, shape index: {}]   ;;  %s5441_s7 = inlined_call_operand.<no memory space> [shape: f32[1,1], index: 7, kind: input, shape index: {}]   ;;  %s5442_s8 = inlined_call_operand.hbm [shape: f32[1,128], index: 8, kind: output, shape index: {}]  }
   0x1   :  { %v13_v0 = vstv %s5441_s7 }
   0x2   :  { %14 = vst [vmem:[#allocation2] sm:$0x1] %v13_v0 }
   0x3   :  { %15 = vsyncpa [#allocation5], 0 }
   0x4   :  { %16 = vsyncpa [#allocation4], 0  ;;  %s23_s9 = sshll.u32 %s5434_s0, 4  ;;  %s24_s9 = int_to_ptr.vmem [resolvable:$true] %s23_s9 }
   0x5   :  { %s3638_s10 = scalar_lea.vmem %s24_s9, 16  ;;  %p3643_p1 = scmp.lt.s32.totalorder %s24_s9, %s24_s9 }
   0x6   :  { %p3639_p0 = scmp.ne.s32.totalorder %s24_s9, %s3638_s10  ;;  %p3644_p2 = scmp.lt.s32.totalorder %s3638_s10, %s3638_s10 }
   0x8   :  { %p3645_p3 = por %p3644_p2, %p3643_p1 }
   0xa   :  { %p3646_p4 = pnand %p3645_p3, %p3639_p0 }
   0xc   :  { %3649 = shalt.err (!%p3646_p4)
}
   0xd   :  { %s3674_s11 = smov [#allocation3]  }
   0xe   :  { %26 = dma.vmem_to_smem %s24_s9, 16, %s3674_s11, [#allocation5]  }
   0xf   :  { %3670 = dma.done.wait [#allocation5], 16  }
  0x10   :  { %3671 = vsyncadd [#allocation5], 4294967280 }
  0x11   :  { %44 = sfence }
  0x12   :  { %v53_v1 = vld [vmem:[%s5435_s1 + $0x28] sm:$0x7]  ;;  %vm247_vm0 = vcmask 1042432   ;;  %v52_v2 = vld [vmem:[%s5435_s1 + $0x20] sm:$0xff]  ;;  %vm102_vm1 = vcmask 351232   ;;  %v51_v3 = vld [vmem:[%s5435_s1 + $0x18] sm:$0xff] }
  0x13   :  { %3328 = vmatprep.subr.msk.mxu1 %vm247_vm0, %v53_v1  ;;  %3244 = vmatprep.subr.msk.mxu0 %vm247_vm0, %v53_v1  ;;  %v713_v4 = vld [vmem:[%s5436_s2 + $0x180] sm:$0xff]  ;;  %v50_v5 = vld [vmem:[%s5435_s1 + $0x10] sm:$0xff]  ;;  %v49_v6 = vld [vmem:[%s5435_s1 + $0x8] sm:$0xff]  ;;  %s45_s26 = sld [smem:[#allocation3]] }
  0x14   :  { %3329 = vmatpush3.msk.msra.mxu1 %vm247_vm0, %v53_v1  ;;  %3245 = vmatpush3.msk.msra.mxu0 %vm247_vm0, %v53_v1  ;;  %v48_v7 = vld [vmem:[%s5435_s1] sm:$0xff]  ;;  %v714_v8 = vld [vmem:[%s5436_s2 + $0x188] sm:$0xff]  ;;  %v715_v9 = vld [vmem:[%s5436_s2 + $0x190] sm:$0xff]  ;;  %s2733_s10 = sld [smem:[#allocation3 + $0x2]] }
  0x15   :  { %3330 = vmatprep.subr.mxu1 %v52_v2  ;;  %3340 = vmatprep.mubr.msk.f32.mxu1 %vm102_vm1, %v713_v4  ;;  %v54_v10 = vld [vmem:[%s5436_s2] sm:$0xff]  ;;  %v55_v11 = vld [vmem:[%s5436_s2 + $0x8] sm:$0xff]  ;;  %v56_v12 = vld [vmem:[%s5436_s2 + $0x10] sm:$0xff] }
  0x16   :  { %3331 = vmatpush3.msra.mxu1 %v52_v2  ;;  %3246 = vmatprep.subr.mxu0 %v52_v2  ;;  %v716_v13 = vld [vmem:[%s5436_s2 + $0x198] sm:$0xff]  ;;  %v717_v14 = vld [vmem:[%s5436_s2 + $0x1a0] sm:$0xff]  ;;  %v718_v17 = vld [vmem:[%s5436_s2 + $0x1a8] sm:$0xff] }
  0x17   :  { %3332 = vmatprep.subr.mxu1 %v51_v3  ;;  %3247 = vmatpush3.msra.mxu0 %v52_v2  ;;  %v57_v15 = vld [vmem:[%s5436_s2 + $0x18] sm:$0xff]  ;;  %v58_v16 = vld [vmem:[%s5436_s2 + $0x20] sm:$0xff]  ;;  %v719_v18 = vld [vmem:[%s5436_s2 + $0x1b0] sm:$0xff] }
  0x18   :  { %3333 = vmatpush3.msra.mxu1 %v51_v3  ;;  %3248 = vmatprep.subr.mxu0 %v51_v3  ;;  %v59_v19 = vld [vmem:[%s5436_s2 + $0x28] sm:$0xff]  ;;  %v60_v20 = vld [vmem:[%s5436_s2 + $0x30] sm:$0xff]  ;;  %v720_v21 = vld [vmem:[%s5436_s2 + $0x1b8] sm:$0xff] }
  0x19   :  { %3334 = vmatprep.subr.mxu1 %v50_v5  ;;  %3249 = vmatpush3.msra.mxu0 %v51_v3  ;;  %v721_v22 = vld [vmem:[%s5436_s2 + $0x1c0] sm:$0xff]  ;;  %v61_v23 = vld [vmem:[%s5436_s2 + $0x38] sm:$0xff]  ;;  %v722_v25 = vld [vmem:[%s5436_s2 + $0x1c8] sm:$0xff] }
  0x1a   :  { %3335 = vmatpush3.msra.mxu1 %v50_v5  ;;  %3250 = vmatprep.subr.mxu0 %v50_v5  ;;  %v62_v24 = vld [vmem:[%s5436_s2 + $0x40] sm:$0xff]  ;;  %v723_v26 = vld [vmem:[%s5436_s2 + $0x1d0] sm:$0xff]  ;;  %v63_v27 = vld [vmem:[%s5436_s2 + $0x48] sm:$0xff] }
  0x1b   :  { %3336 = vmatprep.subr.mxu1 %v49_v6  ;;  %3251 = vmatpush3.msra.mxu0 %v50_v5  ;;  %v64_v28 = vld [vmem:[%s5436_s2 + $0x50] sm:$0xff]  ;;  %v724_v29 = vld [vmem:[%s5436_s2 + $0x1d8] sm:$0xff]  ;;  %v725_v30 = vld [vmem:[%s5436_s2 + $0x1e0] sm:$0xff] }
  0x1c   :  { %3337 = vmatpush3.msra.mxu1 %v49_v6  ;;  %3252 = vmatprep.subr.mxu0 %v49_v6  ;;  %v65_v31 = vld [vmem:[%s5436_s2 + $0x58] sm:$0xff]  ;;  %v66_v32 = vld [vmem:[%s5436_s2 + $0x60] sm:$0xff]  ;;  %v726_v33 = vld [vmem:[%s5436_s2 + $0x1e8] sm:$0xff] }
  0x1d   :  { %3338 = vmatprep.subr.mxu1 %v48_v7  ;;  %3253 = vmatpush3.msra.mxu0 %v49_v6  ;;  %v727_v34 = vld [vmem:[%s5436_s2 + $0x1f0] sm:$0xff]  ;;  %v67_v35 = vld [vmem:[%s5436_s2 + $0x68] sm:$0xff]  ;;  %v728_v37 = vld [vmem:[%s5436_s2 + $0x1f8] sm:$0xff] }
  0x1e   :  { %3339 = vmatpush3.msra.mxu1 %v48_v7  ;;  %3254 = vmatprep.subr.mxu0 %v48_v7  ;;  %v68_v36 = vld [vmem:[%s5436_s2 + $0x70] sm:$0xff]  ;;  %v729_v38 = vld [vmem:[%s5436_s2 + $0x200] sm:$0xff]  ;;  %v69_v39 = vld [vmem:[%s5436_s2 + $0x78] sm:$0xff] }
  0x1f   :  { %3341 = vmatmul.mubr.msk.f32.vlgmr.msra.gmra.mxu1 %vm102_vm1, %v714_v8  ;;  %3255 = vmatpush3.msra.mxu0 %v48_v7  ;;  %v70_v40 = vld [vmem:[%s5436_s2 + $0x80] sm:$0xff]  ;;  %v730_v41 = vld [vmem:[%s5436_s2 + $0x208] sm:$0xff]  ;;  %v731_v42 = vld [vmem:[%s5436_s2 + $0x210] sm:$0xff] }
  0x20   :  { %3343 = vmatprep.mubr.msk.f32.mxu1 %vm102_vm1, %v715_v9  ;;  %3256 = vmatprep.mubr.msk.f32.mxu0 %vm102_vm1, %v54_v10  ;;  %v71_v43 = vld [vmem:[%s5436_s2 + $0x88] sm:$0xff]  ;;  %v72_v44 = vld [vmem:[%s5436_s2 + $0x90] sm:$0xff]  ;;  %v732_v45 = vld [vmem:[%s5436_s2 + $0x218] sm:$0xff] }
  0x21   :  { %3257 = vmatmul.mubr.msk.f32.vlgmr.msra.gmra.mxu0 %vm102_vm1, %v55_v11  ;;  %v733_v46 = vld [vmem:[%s5436_s2 + $0x220] sm:$0xff]  ;;  %v73_v47 = vld [vmem:[%s5436_s2 + $0x98] sm:$0xff]  ;;  %v734_v49 = vld [vmem:[%s5436_s2 + $0x228] sm:$0xff] }
  0x22   :  { %3259 = vmatprep.mubr.msk.f32.mxu0 %vm102_vm1, %v56_v12  ;;  %v74_v48 = vld [vmem:[%s5436_s2 + $0xa0] sm:$0xff]  ;;  %v735_v50 = vld [vmem:[%s5436_s2 + $0x230] sm:$0xff]  ;;  %v75_v51 = vld [vmem:[%s5436_s2 + $0xa8] sm:$0xff] }
  0x23   :  { %3344 = vmatmul.mubr.msk.f32.gmra.mxu1 %vm102_vm1, %v716_v13  ;;  %v76_v52 = vld [vmem:[%s5436_s2 + $0xb0] sm:$0xff]  ;;  %v736_v53 = vld [vmem:[%s5436_s2 + $0x238] sm:$0xff]  ;;  %v737_v54 = vld [vmem:[%s5436_s2 + $0x240] sm:$0xff] }
  0x24   :  { %3346 = vmatprep.mubr.msk.f32.mxu1 %vm102_vm1, %v717_v14  ;;  %v77_v55 = vld [vmem:[%s5436_s2 + $0xb8] sm:$0xff]  ;;  %v78_v56 = vld [vmem:[%s5436_s2 + $0xc0] sm:$0xff]  ;;  %v738_v57 = vld [vmem:[%s5436_s2 + $0x248] sm:$0xff] }
  0x25   :  { %3260 = vmatmul.mubr.msk.f32.gmra.mxu0 %vm102_vm1, %v57_v15  ;;  %v739_v58 = vld [vmem:[%s5436_s2 + $0x250] sm:$0xff]  ;;  %v79_v59 = vld [vmem:[%s5436_s2 + $0xc8] sm:$0xff]  ;;  %v740_v61 = vld [vmem:[%s5436_s2 + $0x258] sm:$0xff] }
  0x26   :  { %3262 = vmatprep.mubr.msk.f32.mxu0 %vm102_vm1, %v58_v16  ;;  %v80_v60 = vld [vmem:[%s5436_s2 + $0xd0] sm:$0xff]  ;;  %v741_v62 = vld [vmem:[%s5436_s2 + $0x260] sm:$0xff]  ;;  %v81_v63 = vld [vmem:[%s5436_s2 + $0xd8] sm:$0xff] }
  0x27   :  { %3347 = vmatmul.mubr.msk.f32.gmra.mxu1 %vm102_vm1, %v718_v17  ;;  %v82_v0 = vld [vmem:[%s5436_s2 + $0xe0] sm:$0xff]  ;;  %v742_v1 = vld [vmem:[%s5436_s2 + $0x268] sm:$0xff]  ;;  %v743_v2 = vld [vmem:[%s5436_s2 + $0x270] sm:$0xff] }
  0x28   :  { %3349 = vmatprep.mubr.msk.f32.mxu1 %vm102_vm1, %v719_v18  ;;  %v83_v3 = vld [vmem:[%s5436_s2 + $0xe8] sm:$0xff]  ;;  %v84_v4 = vld [vmem:[%s5436_s2 + $0xf0] sm:$0xff]  ;;  %v744_v5 = vld [vmem:[%s5436_s2 + $0x278] sm:$0xff] }
  0x29   :  { %3263 = vmatmul.mubr.msk.f32.gmra.mxu0 %vm102_vm1, %v59_v19  ;;  %v745_v6 = vld [vmem:[%s5436_s2 + $0x280] sm:$0xff]  ;;  %v85_v7 = vld [vmem:[%s5436_s2 + $0xf8] sm:$0xff]  ;;  %v746_v9 = vld [vmem:[%s5436_s2 + $0x288] sm:$0xff] }
  0x2a   :  { %3265 = vmatprep.mubr.msk.f32.mxu0 %vm102_vm1, %v60_v20  ;;  %v86_v8 = vld [vmem:[%s5436_s2 + $0x100] sm:$0xff]  ;;  %v747_v10 = vld [vmem:[%s5436_s2 + $0x290] sm:$0xff]  ;;  %v87_v11 = vld [vmem:[%s5436_s2 + $0x108] sm:$0xff] }
  0x2b   :  { %3350 = vmatmul.mubr.msk.f32.gmra.mxu1 %vm102_vm1, %v720_v21  ;;  %v88_v12 = vld [vmem:[%s5436_s2 + $0x110] sm:$0xff]  ;;  %v748_v13 = vld [vmem:[%s5436_s2 + $0x298] sm:$0xff]  ;;  %v749_v14 = vld [vmem:[%s5436_s2 + $0x2a0] sm:$0xff] }
  0x2c   :  { %3352 = vmatprep.mubr.msk.f32.mxu1 %vm102_vm1, %v721_v22  ;;  %v89_v15 = vld [vmem:[%s5436_s2 + $0x118] sm:$0xff]  ;;  %v90_v16 = vld [vmem:[%s5436_s2 + $0x120] sm:$0xff]  ;;  %v750_v17 = vld [vmem:[%s5436_s2 + $0x2a8] sm:$0xff] }
  0x2d   :  { %3266 = vmatmul.mubr.msk.f32.gmra.mxu0 %vm102_vm1, %v61_v23  ;;  %v751_v18 = vld [vmem:[%s5436_s2 + $0x2b0] sm:$0xff]  ;;  %v91_v19 = vld [vmem:[%s5436_s2 + $0x128] sm:$0xff]  ;;  %v752_v21 = vld [vmem:[%s5436_s2 + $0x2b8] sm:$0xff] }
  0x2e   :  { %3268 = vmatprep.mubr.msk.f32.mxu0 %vm102_vm1, %v62_v24  ;;  %v92_v20 = vld [vmem:[%s5436_s2 + $0x130] sm:$0xff]  ;;  %v753_v22 = vld [vmem:[%s5436_s2 + $0x2c0] sm:$0xff]  ;;  %v93_v23 = vld [vmem:[%s5436_s2 + $0x138] sm:$0xff] }
  0x2f   :  { %3353 = vmatmul.mubr.msk.f32.gmra.mxu1 %vm102_vm1, %v722_v25  ;;  %v94_v24 = vld [vmem:[%s5436_s2 + $0x140] sm:$0xff]  ;;  %v754_v25 = vld [vmem:[%s5436_s2 + $0x2c8] sm:$0xff] }
  0x30   :  { %3355 = vmatprep.mubr.msk.f32.mxu1 %vm102_vm1, %v723_v26  ;;  %v755_v26 = vld [vmem:[%s5436_s2 + $0x2d0] sm:$0xff] }
  0x31   :  { %3269 = vmatmul.mubr.msk.f32.gmra.mxu0 %vm102_vm1, %v63_v27  ;;  %v95_v27 = vld [vmem:[%s5436_s2 + $0x148] sm:$0xff] }
  0x32   :  { %3271 = vmatprep.mubr.msk.f32.mxu0 %vm102_vm1, %v64_v28  ;;  %v96_v28 = vld [vmem:[%s5436_s2 + $0x150] sm:$0xff] }
  0x33   :  { %3356 = vmatmul.mubr.msk.f32.gmra.mxu1 %vm102_vm1, %v724_v29  ;;  %v756_v29 = vld [vmem:[%s5436_s2 + $0x2d8] sm:$0xff] }
  0x34   :  { %3358 = vmatprep.mubr.msk.f32.mxu1 %vm102_vm1, %v725_v30  ;;  %v757_v30 = vld [vmem:[%s5436_s2 + $0x2e0] sm:$0xff] }
  0x35   :  { %3272 = vmatmul.mubr.msk.f32.gmra.mxu0 %vm102_vm1, %v65_v31  ;;  %v97_v31 = vld [vmem:[%s5436_s2 + $0x158] sm:$0xff] }
  0x36   :  { %3274 = vmatprep.mubr.msk.f32.mxu0 %vm102_vm1, %v66_v32  ;;  %v98_v32 = vld [vmem:[%s5436_s2 + $0x160] sm:$0xff] }
  0x37   :  { %3359 = vmatmul.mubr.msk.f32.gmra.mxu1 %vm102_vm1, %v726_v33  ;;  %v758_v33 = vld [vmem:[%s5436_s2 + $0x2e8] sm:$0xff] }
  0x38   :  { %3361 = vmatprep.mubr.msk.f32.mxu1 %vm102_vm1, %v727_v34  ;;  %v759_v34 = vld [vmem:[%s5436_s2 + $0x2f0] sm:$0xff] }
  0x39   :  { %3275 = vmatmul.mubr.msk.f32.gmra.mxu0 %vm102_vm1, %v67_v35  ;;  %v99_v35 = vld [vmem:[%s5436_s2 + $0x168] sm:$0xff] }
  0x3a   :  { %3277 = vmatprep.mubr.msk.f32.mxu0 %vm102_vm1, %v68_v36  ;;  %v100_v36 = vld [vmem:[%s5436_s2 + $0x170] sm:$0xff] }
  0x3b   :  { %3362 = vmatmul.mubr.msk.f32.gmra.mxu1 %vm102_vm1, %v728_v37  ;;  %v760_v37 = vld [vmem:[%s5436_s2 + $0x2f8] sm:$0xff] }
  0x3c   :  { %3364 = vmatprep.mubr.msk.f32.mxu1 %vm102_vm1, %v729_v38  ;;  %v101_v38 = vld [vmem:[%s5436_s2 + $0x178] sm:$0xff] }
  0x3d   :  { %3278 = vmatmul.mubr.msk.f32.gmra.mxu0 %vm102_vm1, %v69_v39  ;;  %v1355_v39 = vld [vmem:[%s5437_s3 + $0x20] sm:$0xff] }
  0x3e   :  { %3280 = vmatprep.mubr.msk.f32.mxu0 %vm102_vm1, %v70_v40  ;;  %v1356_v40 = vld [vmem:[%s5437_s3 + $0x28] sm:$0xff] }
  0x3f   :  { %3365 = vmatmul.mubr.msk.f32.gmra.mxu1 %vm102_vm1, %v730_v41 }
  0x40   :  { %3367 = vmatprep.mubr.msk.f32.mxu1 %vm102_vm1, %v731_v42 }
  0x41   :  { %3281 = vmatmul.mubr.msk.f32.gmra.mxu0 %vm102_vm1, %v71_v43 }
  0x42   :  { %3283 = vmatprep.mubr.msk.f32.mxu0 %vm102_vm1, %v72_v44 }
  0x43   :  { %3368 = vmatmul.mubr.msk.f32.gmra.mxu1 %vm102_vm1, %v732_v45 }
  0x44   :  { %3370 = vmatprep.mubr.msk.f32.mxu1 %vm102_vm1, %v733_v46 }
  0x45   :  { %3284 = vmatmul.mubr.msk.f32.gmra.mxu0 %vm102_vm1, %v73_v47 }
  0x46   :  { %3286 = vmatprep.mubr.msk.f32.mxu0 %vm102_vm1, %v74_v48 }
  0x47   :  { %3371 = vmatmul.mubr.msk.f32.gmra.mxu1 %vm102_vm1, %v734_v49 }
  0x48   :  { %3373 = vmatprep.mubr.msk.f32.mxu1 %vm102_vm1, %v735_v50 }
  0x49   :  { %3287 = vmatmul.mubr.msk.f32.gmra.mxu0 %vm102_vm1, %v75_v51 }
  0x4a   :  { %3289 = vmatprep.mubr.msk.f32.mxu0 %vm102_vm1, %v76_v52 }
  0x4b   :  { %3374 = vmatmul.mubr.msk.f32.gmra.mxu1 %vm102_vm1, %v736_v53 }
  0x4c   :  { %3376 = vmatprep.mubr.msk.f32.mxu1 %vm102_vm1, %v737_v54 }
  0x4d   :  { %3290 = vmatmul.mubr.msk.f32.gmra.mxu0 %vm102_vm1, %v77_v55 }
  0x4e   :  { %3292 = vmatprep.mubr.msk.f32.mxu0 %vm102_vm1, %v78_v56 }
  0x4f   :  { %3377 = vmatmul.mubr.msk.f32.gmra.mxu1 %vm102_vm1, %v738_v57 }
  0x50   :  { %3379 = vmatprep.mubr.msk.f32.mxu1 %vm102_vm1, %v739_v58 }
  0x51   :  { %3293 = vmatmul.mubr.msk.f32.gmra.mxu0 %vm102_vm1, %v79_v59 }
  0x52   :  { %3295 = vmatprep.mubr.msk.f32.mxu0 %vm102_vm1, %v80_v60 }
  0x53   :  { %3380 = vmatmul.mubr.msk.f32.gmra.mxu1 %vm102_vm1, %v740_v61 }
  0x54   :  { %3382 = vmatprep.mubr.msk.f32.mxu1 %vm102_vm1, %v741_v62 }
  0x55   :  { %3296 = vmatmul.mubr.msk.f32.gmra.mxu0 %vm102_vm1, %v81_v63 }
  0x56   :  { %3298 = vmatprep.mubr.msk.f32.mxu0 %vm102_vm1, %v82_v0 }
  0x57   :  { %3383 = vmatmul.mubr.msk.f32.gmra.mxu1 %vm102_vm1, %v742_v1 }
  0x58   :  { %3385 = vmatprep.mubr.msk.f32.mxu1 %vm102_vm1, %v743_v2 }
  0x59   :  { %3299 = vmatmul.mubr.msk.f32.gmra.mxu0 %vm102_vm1, %v83_v3 }
  0x5a   :  { %3301 = vmatprep.mubr.msk.f32.mxu0 %vm102_vm1, %v84_v4 }
  0x5b   :  { %3386 = vmatmul.mubr.msk.f32.gmra.mxu1 %vm102_vm1, %v744_v5 }
  0x5c   :  { %3388 = vmatprep.mubr.msk.f32.mxu1 %vm102_vm1, %v745_v6 }
  0x5d   :  { %3302 = vmatmul.mubr.msk.f32.gmra.mxu0 %vm102_vm1, %v85_v7 }
  0x5e   :  { %3304 = vmatprep.mubr.msk.f32.mxu0 %vm102_vm1, %v86_v8 }
  0x5f   :  { %3389 = vmatmul.mubr.msk.f32.gmra.mxu1 %vm102_vm1, %v746_v9 }
  0x60   :  { %3391 = vmatprep.mubr.msk.f32.mxu1 %vm102_vm1, %v747_v10 }
  0x61   :  { %3305 = vmatmul.mubr.msk.f32.gmra.mxu0 %vm102_vm1, %v87_v11 }
  0x62   :  { %3307 = vmatprep.mubr.msk.f32.mxu0 %vm102_vm1, %v88_v12 }
  0x63   :  { %3392 = vmatmul.mubr.msk.f32.gmra.mxu1 %vm102_vm1, %v748_v13 }
  0x64   :  { %3394 = vmatprep.mubr.msk.f32.mxu1 %vm102_vm1, %v749_v14 }
  0x65   :  { %3308 = vmatmul.mubr.msk.f32.gmra.mxu0 %vm102_vm1, %v89_v15 }
  0x66   :  { %3310 = vmatprep.mubr.msk.f32.mxu0 %vm102_vm1, %v90_v16 }
  0x67   :  { %3395 = vmatmul.mubr.msk.f32.gmra.mxu1 %vm102_vm1, %v750_v17 }
  0x68   :  { %3397 = vmatprep.mubr.msk.f32.mxu1 %vm102_vm1, %v751_v18 }
  0x69   :  { %3311 = vmatmul.mubr.msk.f32.gmra.mxu0 %vm102_vm1, %v91_v19 }
  0x6a   :  { %3313 = vmatprep.mubr.msk.f32.mxu0 %vm102_vm1, %v92_v20 }
  0x6b   :  { %3398 = vmatmul.mubr.msk.f32.gmra.mxu1 %vm102_vm1, %v752_v21 }
  0x6c   :  { %3400 = vmatprep.mubr.msk.f32.mxu1 %vm102_vm1, %v753_v22 }
  0x6d   :  { %3314 = vmatmul.mubr.msk.f32.gmra.mxu0 %vm102_vm1, %v93_v23 }
  0x6e   :  { %3316 = vmatprep.mubr.msk.f32.mxu0 %vm102_vm1, %v94_v24 }
  0x6f   :  { %3401 = vmatmul.mubr.msk.f32.gmra.mxu1 %vm102_vm1, %v754_v25 }
  0x70   :  { %3403 = vmatprep.mubr.msk.f32.mxu1 %vm102_vm1, %v755_v26 }
  0x71   :  { %3317 = vmatmul.mubr.msk.f32.gmra.mxu0 %vm102_vm1, %v95_v27 }
  0x72   :  { %3319 = vmatprep.mubr.msk.f32.mxu0 %vm102_vm1, %v96_v28 }
  0x73   :  { %3404 = vmatmul.mubr.msk.f32.gmra.mxu1 %vm102_vm1, %v756_v29 }
  0x74   :  { %3406 = vmatprep.mubr.msk.f32.mxu1 %vm102_vm1, %v757_v30 }
  0x75   :  { %3320 = vmatmul.mubr.msk.f32.gmra.mxu0 %vm102_vm1, %v97_v31 }
  0x76   :  { %3322 = vmatprep.mubr.msk.f32.mxu0 %vm102_vm1, %v98_v32 }
  0x77   :  { %3407 = vmatmul.mubr.msk.f32.gmra.mxu1 %vm102_vm1, %v758_v33 }
  0x78   :  { %3409 = vmatprep.mubr.msk.f32.mxu1 %vm102_vm1, %v759_v34 }
  0x79   :  { %3323 = vmatmul.mubr.msk.f32.gmra.mxu0 %vm102_vm1, %v99_v35 }
  0x7a   :  { %3325 = vmatprep.mubr.msk.f32.mxu0 %vm102_vm1, %v100_v36  ;;  %v4250_v36 = vstv %s45_s26 }
  0x7b   :  { %3410 = vmatmul.mubr.msk.f32.gmra.mxu1 %vm102_vm1, %v760_v37 }
  0x7c   :  { %3444 = vmatprep.mubr.f32.mxu1 %v1356_v40 }
  0x7d   :  { %3326 = vmatmul.mubr.msk.f32.gmra.mxu0 %vm102_vm1, %v101_v38 }
  0x7e   :  { %1430 = vmatprep.mubr.f32.mxu0 %v1355_v39 }
  0xdf   :  { %v4142_v41 = vpop.f32.mrf.mxu1 }
  0xe1   :  { %v4144_v42 = vpop.f32.mrf.mxu1  ;;  %v4146_v43 = vpop.f32.mrf.mxu0 }
  0xe3   :  { %v4148_v44 = vpop.f32.mrf.mxu1  ;;  %v4150_v45 = vpop.f32.mrf.mxu0 }
  0xe4   :  { %5457 = vst [vmem:[#allocation9_spill] sm:$0xff] %v4150_v45 }
  0xe5   :  { %v4152_v46 = vpop.f32.mrf.mxu1  ;;  %v4154_v47 = vpop.f32.mrf.mxu0 }
  0xe7   :  { %v4156_v48 = vpop.f32.mrf.mxu1  ;;  %v4158_v49 = vpop.f32.mrf.mxu0 }
  0xe8   :  { %5458 = vst [vmem:[#allocation10_spill] sm:$0xff] %v4158_v49 }
  0xe9   :  { %v4160_v50 = vpop.f32.mrf.mxu1  ;;  %v4162_v51 = vpop.f32.mrf.mxu0 }
  0xeb   :  { %v4164_v52 = vpop.f32.mrf.mxu1  ;;  %v4166_v53 = vpop.f32.mrf.mxu0 }
  0xec   :  { %5459 = vst [vmem:[#allocation11_spill] sm:$0xff] %v4166_v53 }
  0xed   :  { %v4168_v54 = vpop.f32.mrf.mxu1  ;;  %v4170_v55 = vpop.f32.mrf.mxu0 }
  0xef   :  { %v4172_v56 = vpop.f32.mrf.mxu1  ;;  %v4174_v57 = vpop.f32.mrf.mxu0 }
  0xf0   :  { %5460 = vst [vmem:[#allocation12_spill] sm:$0xff] %v4174_v57  ;;  %vm1219_vm15 = vcmp.gt.f32.partialorder %v4172_v56, 0.0 }
  0xf1   :  { %v4176_v58 = vpop.f32.mrf.mxu1  ;;  %v4178_v59 = vpop.f32.mrf.mxu0 }
  0xf3   :  { %v4180_v60 = vpop.f32.mrf.mxu1  ;;  %v4182_v61 = vpop.f32.mrf.mxu0 }
  0xf4   :  { %vm1221_vm11 = vcmp.gt.f32.partialorder %v4180_v60, 0.0 }
  0xf5   :  { %v4184_v62 = vpop.f32.mrf.mxu1  ;;  %v4186_v63 = vpop.f32.mrf.mxu0 }
  0xf6   :  { %vm1220_vm13 = vcmp.gt.f32.partialorder %v4184_v62, 0.0 }
  0xf7   :  { %v4188_v0 = vpop.f32.mrf.mxu1  ;;  %v4190_v1 = vpop.f32.mrf.mxu0 }
  0xf8   :  { %vm1223_vm7 = vcmp.gt.f32.partialorder %v4188_v0, 0.0 }
  0xf9   :  { %v4192_v2 = vpop.f32.mrf.mxu1  ;;  %v4194_v3 = vpop.f32.mrf.mxu0 }
  0xfa   :  { %vm1222_vm9 = vcmp.gt.f32.partialorder %v4192_v2, 0.0 }
  0xfb   :  { %v3363_v4 = vpop.f32.mrf.mxu1  ;;  %v4196_v5 = vpop.f32.mrf.mxu0 }
  0xfc   :  { %v1273_v37 = vmul.f32 %v3363_v4, %v4250_v36  ;;  %vm1225_vm2 = vcmp.gt.f32.partialorder %v3363_v4, 0.0 }
  0xfd   :  { %v1041_v6 = vpop.f32.mrf.mxu1  ;;  %v4198_v7 = vpop.f32.mrf.mxu0 }
  0xfe   :  { %vm1224_vm4 = vcmp.gt.f32.partialorder %v1041_v6, 0.0 }
  0xff   :  { %v4200_v8 = vpop.f32.mrf.mxu1  ;;  %v4202_v9 = vpop.f32.mrf.mxu0 }
 0x101   :  { %v4204_v10 = vpop.f32.mrf.mxu1  ;;  %v4206_v11 = vpop.f32.mrf.mxu0 }
 0x102   :  { %5461 = vst [vmem:[#allocation13_spill] sm:$0xff] %v4206_v11 }
 0x103   :  { %v4208_v12 = vpop.f32.mrf.mxu1  ;;  %v4210_v13 = vpop.f32.mrf.mxu0 }
 0x104   :  { %5462 = vst [vmem:[#allocation14_spill] sm:$0xff] %v4210_v13  ;;  %v1272_v13 = vmul.f32 %v1041_v6, %v4250_v36 }
 0x105   :  { %v4212_v14 = vpop.f32.mrf.mxu1  ;;  %v4214_v15 = vpop.f32.mrf.mxu0 }
 0x106   :  { %5463 = vst [vmem:[#allocation15_spill] sm:$0xff] %v4214_v15 }
 0x107   :  { %v4216_v16 = vpop.f32.mrf.mxu1  ;;  %v4218_v17 = vpop.f32.mrf.mxu0 }
 0x108   :  { %5464 = vst [vmem:[#allocation16_spill] sm:$0xff] %v4218_v17 }
 0x109   :  { %v4220_v18 = vpop.f32.mrf.mxu1  ;;  %v4222_v19 = vpop.f32.mrf.mxu0 }
 0x10a   :  { %5465 = vst [vmem:[#allocation17_spill] sm:$0xff] %v4222_v19  ;;  %v1321_v19 = vsel %vm1225_vm2, %v3363_v4, %v1273_v37  ;;  %v1267_v37 = vmul.f32 %v4172_v56, %v4250_v36 }
 0x10b   :  { %v4224_v20 = vpop.f32.mrf.mxu1  ;;  %v4226_v21 = vpop.f32.mrf.mxu0 }
 0x10c   :  { %5466 = vst [vmem:[#allocation18_spill] sm:$0xff] %v4226_v21  ;;  %v1271_v21 = vmul.f32 %v4188_v0, %v4250_v36 }
 0x10d   :  { %v4228_v22 = vpop.f32.mrf.mxu1  ;;  %v4230_v23 = vpop.f32.mrf.mxu0 }
 0x10e   :  { %5467 = vst [vmem:[#allocation19_spill] sm:$0xff] %v4230_v23 }
 0x10f   :  { %v4232_v24 = vpop.f32.mrf.mxu1  ;;  %v4234_v25 = vpop.f32.mrf.mxu0 }
 0x110   :  { %5468 = vst [vmem:[#allocation20_spill] sm:$0xff] %v4234_v25  ;;  %vm1235_vm14 = vcmp.gt.f32.partialorder %v4232_v24, 0.0 }
 0x111   :  { %v4236_v26 = vpop.f32.mrf.mxu1  ;;  %v4238_v27 = vpop.f32.mrf.mxu0 }
 0x112   :  { %vm1234_vm2 = vcmp.gt.f32.partialorder %v4236_v26, 0.0 }
 0x113   :  { %v3381_v28 = vpop.f32.mrf.mxu1  ;;  %v4240_v29 = vpop.f32.mrf.mxu0 }
 0x114   :  { %5469 = vst [vmem:[#allocation21_spill] sm:$0xff] %v4240_v29  ;;  %v1270_v29 = vmul.f32 %v4192_v2, %v4250_v36  ;;  %v1285_v4 = vmul.f32 %v3381_v28, %v4250_v36  ;;  %vm1237_vm10 = vcmp.gt.f32.partialorder %v3381_v28, 0.0 }
 0x115   :  { %v4242_v30 = vpop.f32.mrf.mxu1  ;;  %v4244_v31 = vpop.f32.mrf.mxu0 }
 0x116   :  { %vm1236_vm12 = vcmp.gt.f32.partialorder %v4242_v30, 0.0 }
 0x117   :  { %v3384_v32 = vpop.f32.mrf.mxu1  ;;  %v4246_v33 = vpop.f32.mrf.mxu0 }
 0x118   :  { %v1287_v17 = vmul.f32 %v3384_v32, %v4250_v36  ;;  %vm1239_vm6 = vcmp.gt.f32.partialorder %v3384_v32, 0.0 }
 0x119   :  { %v1111_v34 = vpop.f32.mrf.mxu1  ;;  %v4248_v35 = vpop.f32.mrf.mxu0 }
 0x11a   :  { %v1286_v57 = vmul.f32 %v1111_v34, %v4250_v36  ;;  %vm1238_vm8 = vcmp.gt.f32.partialorder %v1111_v34, 0.0 }
 0x11b   :  { %v3387_v38 = vpop.f32.mrf.mxu1  ;;  %v4253_v39 = vpop.f32.mrf.mxu0 }
 0x11c   :  { %vm1241_vm3 = vcmp.gt.f32.partialorder %v3387_v38, 0.0  ;;  %v1289_v40 = vmul.f32 %v3387_v38, %v4250_v36 }
 0x11d   :  { %v1121_v45 = vpop.f32.mrf.mxu1  ;;  %v4257_v11 = vpop.f32.mrf.mxu0 }
 0x11e   :  { %vm1240_vm5 = vcmp.gt.f32.partialorder %v1121_v45, 0.0  ;;  %v1288_v49 = vmul.f32 %v1121_v45, %v4250_v36  ;;  %v1337_v15 = vsel %vm1241_vm3, %v3387_v38, %v1289_v40  ;;  %v1320_v40 = vsel %vm1224_vm4, %v1041_v6, %v1272_v13 }
 0x11f   :  { %v4263_v53 = vpop.f32.mrf.mxu1  ;;  %2991 = vmatprep.subr.mxu0 %v1337_v15  ;;  %v4265_v25 = vpop.f32.mrf.mxu0  ;;  %v1335_v15 = vsel %vm1239_vm6, %v3384_v32, %v1287_v17  ;;  %v1319_v6 = vsel %vm1223_vm7, %v4188_v0, %v1271_v21  ;;  %v1334_v17 = vsel %vm1238_vm8, %v1111_v34, %v1286_v57  ;;  %v1318_v0 = vsel %vm1222_vm9, %v4192_v2, %v1270_v29 }
 0x120   :  { %5470 = vst [vmem:[#allocation22_spill] sm:$0xff] %v4263_v53  ;;  %2992 = vmatpush3.msra.mxu0 %v1321_v19  ;;  %v1336_v23 = vsel %vm1240_vm5, %v1121_v45, %v1288_v49  ;;  %v1269_v45 = vmul.f32 %v4180_v60, %v4250_v36  ;;  %v1284_v19 = vmul.f32 %v4242_v30, %v4250_v36  ;;  %vm1218_vm3 = vcmp.gt.f32.partialorder %v4176_v58, 0.0 }
 0x121   :  { %v4271_v38 = vpop.f32.mrf.mxu1  ;;  %2993 = vmatprep.subr.mxu0 %v1336_v23  ;;  %v4274_v53 = vpop.f32.mrf.mxu0  ;;  %v1268_v23 = vmul.f32 %v4184_v62, %v4250_v36  ;;  %v1283_v21 = vmul.f32 %v4232_v24, %v4250_v36  ;;  %v1333_v57 = vsel %vm1237_vm10, %v3381_v28, %v1285_v4  ;;  %v1282_v29 = vmul.f32 %v4236_v26, %v4250_v36 }
 0x122   :  { %2994 = vmatpush3.msra.mxu0 %v1320_v40  ;;  %v1317_v2 = vsel %vm1221_vm11, %v4180_v60, %v1269_v45  ;;  %v1332_v28 = vsel %vm1236_vm12, %v4242_v30, %v1284_v19  ;;  %v1266_v4 = vmul.f32 %v4176_v58, %v4250_v36  ;;  %v1281_v45 = vmul.f32 %v4224_v20, %v4250_v36 }
 0x123   :  { %v4281_v49 = vpop.f32.mrf.mxu1  ;;  %2995 = vmatprep.subr.mxu0 %v1335_v15  ;;  %v4286_v13 = vpop.f32.mrf.mxu0  ;;  %v1316_v60 = vsel %vm1220_vm13, %v4184_v62, %v1268_v23  ;;  %v1331_v30 = vsel %vm1235_vm14, %v4232_v24, %v1283_v21  ;;  %v1265_v19 = vmul.f32 %v4164_v52, %v4250_v36  ;;  %vm1233_vm4 = vcmp.gt.f32.partialorder %v4224_v20, 0.0 }
 0x124   :  { %2996 = vmatpush3.msra.mxu0 %v1319_v6  ;;  %v1315_v62 = vsel %vm1219_vm15, %v4172_v56, %v1267_v37  ;;  %vm1217_vm5 = vcmp.gt.f32.partialorder %v4164_v52, 0.0  ;;  %v1280_v23 = vmul.f32 %v4228_v22, %v4250_v36  ;;  %v1330_v24 = vsel %vm1234_vm2, %v4236_v26, %v1282_v29 }
 0x125   :  { %v4295_v32 = vpop.f32.mrf.mxu1  ;;  %2997 = vmatprep.subr.mxu0 %v1334_v17  ;;  %v4304_v34 = vpop.f32.mrf.mxu0  ;;  %vm1232_vm6 = vcmp.gt.f32.partialorder %v4228_v22, 0.0  ;;  %v1314_v56 = vsel %vm1218_vm3, %v4176_v58, %v1266_v4  ;;  %vm1216_vm7 = vcmp.gt.f32.partialorder %v4168_v54, 0.0  ;;  %v1329_v26 = vsel %vm1233_vm4, %v4224_v20, %v1281_v45 }
 0x126   :  { %2998 = vmatpush3.msra.mxu0 %v1318_v0  ;;  %v1264_v0 = vmul.f32 %v4168_v54, %v4250_v36  ;;  %vm1231_vm8 = vcmp.gt.f32.partialorder %v4216_v16, 0.0  ;;  %v1313_v58 = vsel %vm1217_vm5, %v4164_v52, %v1265_v19  ;;  %vm1215_vm9 = vcmp.gt.f32.partialorder %v4156_v48, 0.0 }
 0x127   :  { %v4309_v40 = vpop.f32.mrf.mxu1  ;;  %2999 = vmatprep.subr.mxu0 %v1333_v57  ;;  %v4334_v6 = vpop.f32.mrf.mxu0  ;;  %v1279_v57 = vmul.f32 %v4216_v16, %v4250_v36  ;;  %v1328_v20 = vsel %vm1232_vm6, %v4228_v22, %v1280_v23  ;;  %v1262_v4 = vmul.f32 %v4160_v50, %v4250_v36  ;;  %vm1230_vm10 = vcmp.gt.f32.partialorder %v4220_v18, 0.0 }
 0x128   :  { %3000 = vmatpush3.msra.mxu0 %v1317_v2  ;;  %v1263_v2 = vmul.f32 %v4156_v48, %v4250_v36  ;;  %v1312_v52 = vsel %vm1216_vm7, %v4168_v54, %v1264_v0  ;;  %vm1211_vm11 = vcmp.gt.f32.partialorder %v4142_v41, 0.0  ;;  %vm1214_vm12 = vcmp.gt.f32.partialorder %v4160_v50, 0.0 }
 0x129   :  { %v4323_v15 = vpop.f32.mrf.mxu1  ;;  %3001 = vmatprep.subr.mxu0 %v1332_v28  ;;  %v4364_v37 = vpop.f32.mrf.mxu0  ;;  %v1278_v28 = vmul.f32 %v4220_v18, %v4250_v36  ;;  %v1277_v45 = vmul.f32 %v4208_v12, %v4250_v36  ;;  %v1327_v22 = vsel %vm1231_vm8, %v4216_v16, %v1279_v57  ;;  %v1259_v19 = vmul.f32 %v4142_v41, %v4250_v36 }
 0x12a   :  { %3002 = vmatpush3.msra.mxu0 %v1316_v60  ;;  %v1261_v54 = vmul.f32 %v4148_v44, %v4250_v36  ;;  %vm1229_vm13 = vcmp.gt.f32.partialorder %v4208_v12, 0.0  ;;  %v1311_v23 = vsel %vm1215_vm9, %v4156_v48, %v1263_v2  ;;  %v1258_v16 = vmul.f32 %v4144_v42, %v4250_v36 }
 0x12b   :  { %v4339_v17 = vpop.f32.mrf.mxu1  ;;  %3003 = vmatprep.subr.mxu0 %v1331_v30  ;;  %v4395_v30 = vpop.f32.mrf.mxu0  ;;  %vm1213_vm14 = vcmp.gt.f32.partialorder %v4148_v44, 0.0  ;;  %v1326_v0 = vsel %vm1230_vm10, %v4220_v18, %v1278_v28  ;;  %vm1210_vm15 = vcmp.gt.f32.partialorder %v4144_v42, 0.0  ;;  %vm1228_vm2 = vcmp.gt.f32.partialorder %v4212_v14, 0.0 }
 0x12c   :  { %3004 = vmatpush3.msra.mxu0 %v1315_v62  ;;  %v1310_v57 = vsel %vm1214_vm12, %v4160_v50, %v1262_v4  ;;  %vm1212_vm3 = vcmp.gt.f32.partialorder %v4152_v46, 0.0  ;;  %v1325_v18 = vsel %vm1229_vm13, %v4208_v12, %v1277_v45  ;;  %vm1227_vm4 = vcmp.gt.f32.partialorder %v4200_v8, 0.0 }
 0x12d   :  { %v4353_v21 = vpop.f32.mrf.mxu1  ;;  %3005 = vmatprep.subr.mxu0 %v1330_v24  ;;  %v1276_v24 = vmul.f32 %v4212_v14, %v4250_v36  ;;  %v4430_v2 = vpop.f32.mrf.mxu0  ;;  %v1309_v50 = vsel %vm1213_vm14, %v4148_v44, %v1261_v54  ;;  %v1307_v4 = vsel %vm1211_vm11, %v4142_v41, %v1259_v19  ;;  %vm1226_vm5 = vcmp.gt.f32.partialorder %v4204_v10, 0.0 }
 0x12e   :  { %3006 = vmatpush3.msra.mxu0 %v1314_v56  ;;  %v1260_v56 = vmul.f32 %v4152_v46, %v4250_v36  ;;  %v4456_v44 = vmul.f32 %v4154_v47, %v4250_v36  ;;  %v636_v41 = vmul.f32 %v4257_v11, %v4250_v36  ;;  %vm587_vm6 = vcmp.gt.f32.partialorder %v4257_v11, 0.0 }
 0x12f   :  { %v4369_v29 = vpop.f32.mrf.mxu1  ;;  %3007 = vmatprep.subr.mxu0 %v1329_v26  ;;  %v1275_v26 = vmul.f32 %v4200_v8, %v4250_v36  ;;  %v1324_v12 = vsel %vm1228_vm2, %v4212_v14, %v1276_v24  ;;  %v4477_v54 = vpop.f32.mrf.mxu0  ;;  %vm569_vm7 = vcmp.gt.f32.partialorder %v4194_v3, 0.0  ;;  %vm571_vm8 = vcmp.gt.f32.partialorder %v4198_v7, 0.0 }
 0x130   :  { %3008 = vmatpush3.msra.mxu0 %v1313_v58  ;;  %v4434_v58 = vmul.f32 %v4146_v43, %v4250_v36  ;;  %v1308_v14 = vsel %vm1212_vm3, %v4152_v46, %v1260_v56  ;;  %v4481_v46 = vmul.f32 %v4178_v59, %v4250_v36  ;;  %v620_v24 = vmul.f32 %v4198_v7, %v4250_v36 }
 0x131   :  { %v4383_v60 = vpop.f32.mrf.mxu1  ;;  %3009 = vmatprep.subr.mxu0 %v1328_v20  ;;  %v1274_v20 = vmul.f32 %v4204_v10, %v4250_v36  ;;  %v1323_v19 = vsel %vm1227_vm4, %v4200_v8, %v1275_v26  ;;  %vm567_vm10 = vcmp.gt.f32.partialorder %v4186_v63, 0.0  ;;  %v619_v56 = vmul.f32 %v4250_v36, %v4202_v9 }
 0x132   :  { %3010 = vmatpush3.msra.mxu0 %v1312_v52  ;;  %v1306_v52 = vsel %vm1210_vm15, %v4144_v42, %v1258_v16  ;;  %v4471_v42 = vmul.f32 %v4170_v55, %v4250_v36  ;;  %vm586_vm11 = vcmp.gt.f32.partialorder %v4265_v25, 0.0  ;;  %vm570_vm13 = vcmp.gt.f32.partialorder %v4202_v9, 0.0 }
 0x133   :  { %v4402_v62 = vpop.f32.mrf.mxu1  ;;  %3011 = vmatprep.subr.mxu0 %v1327_v22  ;;  %v4467_v22 = vmul.f32 %v4162_v51, %v4250_v36  ;;  %vm585_vm15 = vcmp.gt.f32.partialorder %v4248_v35, 0.0  ;;  %vm565_vm2 = vcmp.gt.f32.partialorder %v4178_v59, 0.0  ;;  %vm584_vm4 = vcmp.gt.f32.partialorder %v4253_v39, 0.0 }
 0x134   :  { %3012 = vmatpush3.msra.mxu0 %v1311_v23  ;;  %v4485_v23 = vmul.f32 %v4186_v63, %v4250_v36 }
 0x135   :  { %v4419_v48 = vpop.f32.mrf.mxu1  ;;  %3013 = vmatprep.subr.mxu0 %v1326_v0  ;;  %v1322_v0 = vsel %vm1226_vm5, %v4204_v10, %v1274_v20  ;;  %v1354_v10 = vld [vmem:[%s5437_s3 + $0x18] sm:$0xff]  ;;  %vm568_vm5 = vcmp.gt.f32.partialorder %v4196_v5, 0.0 }
 0x136   :  { %3014 = vmatpush3.msra.mxu0 %v1310_v57  ;;  %v635_v57 = vmul.f32 %v4250_v36, %v4265_v25 }
 0x137   :  { %v4437_v28 = vpop.f32.mrf.mxu1  ;;  %3015 = vmatprep.subr.mxu0 %v1325_v18  ;;  %v684_v18 = vsel %vm587_vm6, %v4257_v11, %v636_v41  ;;  %v634_v11 = vmul.f32 %v4248_v35, %v4250_v36  ;;  %v668_v41 = vsel %vm571_vm8, %v4198_v7, %v620_v24  ;;  %v1301_v7 = vmul.f32 %v4402_v62, %v4250_v36 }
 0x138   :  { %3016 = vmatpush3.msra.mxu0 %v1309_v50  ;;  %v1303_v50 = vmul.f32 %v4437_v28, %v4250_v36  ;;  %vm1255_vm14 = vcmp.gt.f32.partialorder %v4437_v28, 0.0  ;;  %v667_v24 = vsel %vm570_vm13, %v4202_v9, %v619_v56  ;;  %vm1253_vm6 = vcmp.gt.f32.partialorder %v4402_v62, 0.0 }
 0x139   :  { %v4458_v45 = vpop.f32.mrf.mxu1  ;;  %3017 = vmatprep.subr.mxu0 %v1324_v12  ;;  %vm583_vm8 = vcmp.gt.f32.partialorder %v4244_v31, 0.0  ;;  %v1300_v9 = vmul.f32 %v4419_v48, %v4250_v36  ;;  %vm1251_vm13 = vcmp.gt.f32.partialorder %v4369_v29, 0.0 }
 0x13a   :  { %3018 = vmatpush3.msra.mxu0 %v1308_v14  ;;  %v618_v14 = vmul.f32 %v4194_v3, %v4250_v36  ;;  %vm1254_vm3 = vcmp.gt.f32.partialorder %v4458_v45, 0.0 }
 0x13b   :  { %v3411_v16 = vpop.f32.mrf.mxu1  ;;  %3019 = vmatprep.subr.mxu0 %v1323_v19 }
 0x13c   :  { %vm1257_vm9 = vcmp.gt.f32.partialorder %v3411_v16, 0.0  ;;  %v1305_v8 = vmul.f32 %v3411_v16, %v4250_v36  ;;  %3020 = vmatpush3.msra.mxu0 %v1307_v4  ;;  %v4511_v4 = vpop.f32.mrf.mxu0 }
 0x13d   :  { %v1201_v26 = vpop.f32.mrf.mxu1  ;;  %3021 = vmatprep.subr.mxu0 %v1322_v0  ;;  %v683_v0 = vsel %vm586_vm11, %v4265_v25, %v635_v57  ;;  %v632_v25 = vmul.f32 %v4244_v31, %v4250_v36  ;;  %v682_v57 = vsel %vm585_vm15, %v4248_v35, %v634_v11  ;;  %v615_v35 = vmul.f32 %v4250_v36, %v4190_v1 }
 0x13e   :  { %vm1256_vm12 = vcmp.gt.f32.partialorder %v1201_v26, 0.0  ;;  %v1304_v20 = vmul.f32 %v1201_v26, %v4250_v36  ;;  %3022 = vmatpush3.msra.mxu0 %v1306_v52  ;;  %v1353_v12 = vsel %vm1257_vm9, %v3411_v16, %v1305_v8  ;;  %v1302_v52 = vmul.f32 %v4458_v45, %v4250_v36 }
 0x13f   :  { %3412 = vmatprep.subr.mxu1 %v1353_v12  ;;  %3055 = vmatprep.subr.mxu0 %v684_v18  ;;  %v617_v16 = vmul.f32 %v4250_v36, %v4196_v5  ;;  %v633_v8 = vmul.f32 %v4250_v36, %v4253_v39  ;;  %v4544_v18 = vpop.f32.mrf.mxu0  ;;  %vm563_vm9 = vcmp.gt.f32.partialorder %v4170_v55, 0.0  ;;  %vm1252_vm11 = vcmp.gt.f32.partialorder %v4419_v48, 0.0 }
 0x140   :  { %1431 = vmatmul.mubr.f32.vlgmr.msra.gmra.mxu0 %v1354_v10  ;;  %3413 = vmatpush3.msra.mxu1 %v1353_v12  ;;  %v1352_v19 = vsel %vm1256_vm12, %v1201_v26, %v1304_v20  ;;  %v1351_v26 = vsel %vm1255_vm14, %v4437_v28, %v1303_v50  ;;  %v666_v28 = vsel %vm569_vm7, %v4194_v3, %v618_v14  ;;  %vm582_vm7 = vcmp.gt.f32.partialorder %v4246_v33, 0.0 }
 0x141   :  { %3056 = vmatpush3.msra.mxu0 %v668_v41  ;;  %3414 = vmatprep.subr.mxu1 %v1352_v19  ;;  %v1350_v56 = vsel %vm1254_vm3, %v4458_v45, %v1302_v52  ;;  %v631_v10 = vmul.f32 %v4250_v36, %v4246_v33  ;;  %v681_v3 = vsel %vm584_vm4, %v4253_v39, %v633_v8  ;;  %v4580_v12 = vpop.f32.mrf.mxu0  ;;  %vm566_vm12 = vcmp.gt.f32.partialorder %v4190_v1, 0.0  ;;  %v5471_v52 = vld [vmem:[#allocation21_spill] sm:$0xff] }
 0x142   :  { %3057 = vmatprep.subr.mxu0 %v683_v0  ;;  %3415 = vmatpush3.msra.mxu1 %v1352_v19  ;;  %v1299_v50 = vmul.f32 %v4369_v29, %v4250_v36  ;;  %v665_v45 = vsel %vm568_vm5, %v4196_v5, %v617_v16  ;;  %v1349_v20 = vsel %vm1253_vm6, %v4402_v62, %v1301_v7  ;;  %vm581_vm14 = vcmp.gt.f32.partialorder %v4238_v27, 0.0 }
 0x143   :  { %3058 = vmatpush3.msra.mxu0 %v667_v24  ;;  %3416 = vmatprep.subr.mxu1 %v1351_v26  ;;  %v630_v39 = vmul.f32 %v4238_v27, %v4250_v36  ;;  %v680_v14 = vsel %vm583_vm8, %v4244_v31, %v632_v25  ;;  %v1298_v5 = vmul.f32 %v4383_v60, %v4250_v36  ;;  %vm561_vm15 = vcmp.gt.f32.partialorder %v4162_v51, 0.0  ;;  %v4617_v16 = vpop.f32.mrf.mxu0  ;;  %v5473_v24 = vld [vmem:[#allocation12_spill] sm:$0xff] }
 0x144   :  { %3059 = vmatprep.subr.mxu0 %v682_v57  ;;  %3417 = vmatpush3.msra.mxu1 %v1351_v26  ;;  %v664_v62 = vsel %vm567_vm10, %v4186_v63, %v4485_v23  ;;  %v1348_v11 = vsel %vm1252_vm11, %v4419_v48, %v1300_v9  ;;  %v613_v31 = vmul.f32 %v4250_v36, %v4182_v61  ;;  %vm1250_vm3 = vcmp.gt.f32.partialorder %v4383_v60, 0.0  ;;  %v5474_v26 = vld [vmem:[#allocation20_spill] sm:$0xff] }
 0x145   :  { %3060 = vmatpush3.msra.mxu0 %v666_v28  ;;  %3418 = vmatprep.subr.mxu1 %v1350_v56  ;;  %v629_v41 = vmul.f32 %v4250_v36, %v5471_v52  ;;  %v679_v63 = vsel %vm582_vm7, %v4246_v33, %v631_v10  ;;  %v1297_v23 = vmul.f32 %v4339_v17, %v4250_v36  ;;  %vm580_vm10 = vcmp.gt.f32.partialorder %v5471_v52, 0.0  ;;  %v5472_v33 = vld [vmem:[#allocation19_spill] sm:$0xff]  ;;  %v4654_v9 = vpop.f32.mrf.mxu0  ;;  %v5475_v28 = vld [vmem:[#allocation17_spill] sm:$0xff] }
 0x146   :  { %3061 = vmatprep.subr.mxu0 %v681_v3  ;;  %3419 = vmatpush3.msra.mxu1 %v1350_v56  ;;  %v663_v48 = vsel %vm566_vm12, %v4190_v1, %v615_v35  ;;  %v1347_v19 = vsel %vm1251_vm13, %v4369_v29, %v1299_v50  ;;  %vm564_vm4 = vcmp.gt.f32.partialorder %v4182_v61, 0.0  ;;  %v628_v8 = vmul.f32 %v5472_v33, %v4250_v36  ;;  %v5476_v3 = vld [vmem:[#allocation11_spill] sm:$0xff] }
 0x147   :  { %3062 = vmatpush3.msra.mxu0 %v665_v45  ;;  %3420 = vmatprep.subr.mxu1 %v1349_v20  ;;  %vm1249_vm5 = vcmp.gt.f32.partialorder %v4339_v17, 0.0  ;;  %v678_v0 = vsel %vm581_vm14, %v4238_v27, %v630_v39  ;;  %vm579_vm6 = vcmp.gt.f32.partialorder %v5472_v33, 0.0  ;;  %v1296_v1 = vmul.f32 %v4353_v21, %v4250_v36  ;;  %v5477_v45 = vld [vmem:[#allocation18_spill] sm:$0xff] }
 0x148   :  { %3063 = vmatprep.subr.mxu0 %v680_v14  ;;  %3421 = vmatpush3.msra.mxu1 %v1349_v20  ;;  %v662_v29 = vsel %vm565_vm2, %v4178_v59, %v4481_v46  ;;  %v1346_v7 = vsel %vm1250_vm3, %v4383_v60, %v1298_v5  ;;  %vm559_vm8 = vcmp.gt.f32.partialorder %v4154_v47, 0.0  ;;  %v611_v27 = vmul.f32 %v4250_v36, %v5473_v24  ;;  %v4691_v14 = vpop.f32.mrf.mxu0  ;;  %v5478_v5 = vld [vmem:[#allocation15_spill] sm:$0xff] }
 0x149   :  { %3064 = vmatpush3.msra.mxu0 %v664_v62  ;;  %3422 = vmatprep.subr.mxu1 %v1348_v11  ;;  %v627_v25 = vmul.f32 %v4250_v36, %v5474_v26  ;;  %vm1248_vm11 = vcmp.gt.f32.partialorder %v4353_v21, 0.0  ;;  %v677_v59 = vsel %vm580_vm10, %v5471_v52, %v629_v41  ;;  %v1295_v46 = vmul.f32 %v4309_v40, %v4250_v36  ;;  %v5479_v41 = vld [vmem:[#allocation10_spill] sm:$0xff] }
 0x14a   :  { %3065 = vmatprep.subr.mxu0 %v679_v63  ;;  %3423 = vmatpush3.msra.mxu1 %v1348_v11  ;;  %vm578_vm2 = vcmp.gt.f32.partialorder %v5474_v26, 0.0  ;;  %v661_v60 = vsel %vm564_vm4, %v4182_v61, %v613_v31  ;;  %v1345_v57 = vsel %vm1249_vm5, %v4339_v17, %v1297_v23  ;;  %vm562_vm7 = vcmp.gt.f32.partialorder %v5473_v24, 0.0  ;;  %v5480_v23 = vld [vmem:[#allocation16_spill] sm:$0xff] }
 0x14b   :  { %3066 = vmatpush3.msra.mxu0 %v663_v48  ;;  %3424 = vmatprep.subr.mxu1 %v1347_v19  ;;  %v626_v56 = vmul.f32 %v5475_v28, %v4250_v36  ;;  %vm1247_vm12 = vcmp.gt.f32.partialorder %v4309_v40, 0.0  ;;  %v676_v35 = vsel %vm579_vm6, %v5472_v33, %v628_v8  ;;  %vm577_vm13 = vcmp.gt.f32.partialorder %v5475_v28, 0.0  ;;  %v3327_v8 = vpop.f32.mrf.mxu0 }
 0x14c   :  { %3067 = vmatprep.subr.mxu0 %v678_v0  ;;  %3425 = vmatpush3.msra.mxu1 %v1347_v19  ;;  %v1294_v61 = vmul.f32 %v4323_v15, %v4250_v36  ;;  %v660_v17 = vsel %vm563_vm9, %v4170_v55, %v4471_v42  ;;  %v1344_v10 = vsel %vm1248_vm11, %v4353_v21, %v1296_v1  ;;  %vm557_vm14 = vcmp.gt.f32.partialorder %v4146_v43, 0.0  ;;  %v5482_v0 = vld [vmem:[#allocation13_spill] sm:$0xff] }
 0x14d   :  { %3068 = vmatpush3.msra.mxu0 %v662_v29  ;;  %3426 = vmatprep.subr.mxu1 %v1346_v7  ;;  %v609_v50 = vmul.f32 %v4250_v36, %v5476_v3  ;;  %v625_v20 = vmul.f32 %v4250_v36, %v5477_v45  ;;  %vm1246_vm3 = vcmp.gt.f32.partialorder %v4323_v15, 0.0  ;;  %v675_v55 = vsel %vm578_vm2, %v5474_v26, %v627_v25  ;;  %v5484_v25 = vld [vmem:[#allocation14_spill] sm:$0xff] }
 0x14e   :  { %3069 = vmatprep.subr.mxu0 %v677_v59  ;;  %3427 = vmatpush3.msra.mxu1 %v1346_v7  ;;  %v1293_v42 = vmul.f32 %v4281_v49, %v4250_v36  ;;  %vm576_vm9 = vcmp.gt.f32.partialorder %v5477_v45, 0.0  ;;  %v659_v21 = vsel %vm562_vm7, %v5473_v24, %v611_v27  ;;  %v1343_v39 = vsel %vm1247_vm12, %v4309_v40, %v1295_v46  ;;  %v5483_v27 = vld [vmem:[#allocation9_spill] sm:$0xff] }
 0x14f   :  { %3070 = vmatpush3.msra.mxu0 %v661_v60  ;;  %3428 = vmatprep.subr.mxu1 %v1345_v57  ;;  %vm560_vm10 = vcmp.gt.f32.partialorder %v5476_v3, 0.0  ;;  %v624_v62 = vmul.f32 %v5478_v5, %v4250_v36  ;;  %vm1245_vm4 = vcmp.gt.f32.partialorder %v4281_v49, 0.0  ;;  %v674_v11 = vsel %vm577_vm13, %v5475_v28, %v626_v56  ;;  %v547_v60 = vpop.f32.mrf.mxu0 }
 0x150   :  { %3071 = vmatprep.subr.mxu0 %v676_v35  ;;  %3429 = vmatpush3.msra.mxu1 %v1345_v57  ;;  %vm575_vm5 = vcmp.gt.f32.partialorder %v5478_v5, 0.0  ;;  %v1292_v40 = vmul.f32 %v4295_v32, %v4250_v36  ;;  %v658_v31 = vsel %vm561_vm15, %v4162_v51, %v4467_v22  ;;  %v1342_v52 = vsel %vm1246_vm3, %v4323_v15, %v1294_v61  ;;  %v5481_v51 = vld [vmem:[#allocation22_spill] sm:$0xff] }
 0x151   :  { %3072 = vmatpush3.msra.mxu0 %v660_v17  ;;  %3430 = vmatprep.subr.mxu1 %v1344_v10  ;;  %v607_v63 = vmul.f32 %v4250_v36, %v5479_v41  ;;  %v623_v48 = vmul.f32 %v4250_v36, %v5480_v23  ;;  %vm1244_vm6 = vcmp.gt.f32.partialorder %v4295_v32, 0.0  ;;  %v673_v19 = vsel %vm576_vm9, %v5477_v45, %v625_v20  ;;  %v1359_v17 = vld [vmem:[%s5437_s3 + $0x70] sm:$0xff] }
 0x152   :  { %3073 = vmatprep.subr.mxu0 %v675_v55  ;;  %3431 = vmatpush3.msra.mxu1 %v1344_v10  ;;  %v1291_v22 = vmul.f32 %v5481_v51, %v4250_v36  ;;  %vm574_vm15 = vcmp.gt.f32.partialorder %v5480_v23, 0.0  ;;  %v657_v15 = vsel %vm560_vm10, %v5476_v3, %v609_v50  ;;  %v1341_v33 = vsel %vm1245_vm4, %v4281_v49, %v1293_v42  ;;  %v1362_v10 = vld [vmem:[%s5437_s3 + $0xb8] sm:$0xff]  ;;  %v1357_v50 = vld [vmem:[%s5437_s3 + $0x60] sm:$0xff]  ;;  %v1361_v45 = vld [vmem:[%s5437_s3 + $0xb0] sm:$0xff] }
 0x153   :  { %3074 = vmatpush3.msra.mxu0 %v659_v21  ;;  %3432 = vmatprep.subr.mxu1 %v1343_v39  ;;  %vm558_vm11 = vcmp.gt.f32.partialorder %v5479_v41, 0.0  ;;  %v622_v1 = vmul.f32 %v5482_v0, %v4250_v36  ;;  %vm1243_vm2 = vcmp.gt.f32.partialorder %v5481_v51, 0.0  ;;  %v672_v29 = vsel %vm575_vm5, %v5478_v5, %v624_v62  ;;  %v1365_v42 = vld [vmem:[%s5437_s3 + $0x100] sm:$0xff]  ;;  %v703_v21 = vld [vmem:[%s5437_s3 + $0x10] sm:$0xff]  ;;  %v1360_v62 = vld [vmem:[%s5437_s3 + $0xa8] sm:$0xff] }
 0x154   :  { %3075 = vmatprep.subr.mxu0 %v674_v11  ;;  %3433 = vmatpush3.msra.mxu1 %v1343_v39  ;;  %vm573_vm7 = vcmp.gt.f32.partialorder %v5482_v0, 0.0  ;;  %v1290_v7 = vmul.f32 %v4271_v38, %v4250_v36  ;;  %v656_v49 = vsel %vm559_vm8, %v4154_v47, %v4456_v44  ;;  %v1340_v24 = vsel %vm1244_vm6, %v4295_v32, %v1292_v40  ;;  %v1364_v11 = vld [vmem:[%s5437_s3 + $0xf8] sm:$0xff] }
 0x155   :  { %3076 = vmatpush3.msra.mxu0 %v658_v31  ;;  %3434 = vmatprep.subr.mxu1 %v1342_v52  ;;  %v605_v26 = vmul.f32 %v4250_v36, %v5483_v27  ;;  %v621_v59 = vmul.f32 %v4250_v36, %v5484_v25  ;;  %vm1242_vm12 = vcmp.gt.f32.partialorder %v4271_v38, 0.0  ;;  %v671_v46 = vsel %vm574_vm15, %v5480_v23, %v623_v48 }
 0x156   :  { %3077 = vmatprep.subr.mxu0 %v673_v19  ;;  %3435 = vmatpush3.msra.mxu1 %v1342_v52  ;;  %vm572_vm8 = vcmp.gt.f32.partialorder %v5484_v25, 0.0  ;;  %v655_v47 = vsel %vm558_vm11, %v5479_v41, %v607_v63  ;;  %v652_v32 = vmul.f32 %v3327_v8, %v4250_v36  ;;  %v1339_v44 = vsel %vm1243_vm2, %v5481_v51, %v1291_v22  ;;  %v1363_v41 = vld [vmem:[%s5437_s3 + $0xf0] sm:$0xff]  ;;  %v701_v19 = vld [vmem:[%s5437_s3] sm:$0xff] }
 0x157   :  { %3078 = vmatpush3.msra.mxu0 %v657_v15  ;;  %3436 = vmatprep.subr.mxu1 %v1341_v33  ;;  %vm556_vm13 = vcmp.gt.f32.partialorder %v5483_v27, 0.0  ;;  %vm603_vm3 = vcmp.gt.f32.partialorder %v3327_v8, 0.0  ;;  %v670_v57 = vsel %vm573_vm7, %v5482_v0, %v622_v1  ;;  %v654_v28 = vsel %vm557_vm14, %v4146_v43, %v4434_v58  ;;  %v1358_v43 = vld [vmem:[%s5437_s3 + $0x68] sm:$0xff] }
 0x158   :  { %3079 = vmatprep.subr.mxu0 %v672_v29  ;;  %3437 = vmatpush3.msra.mxu1 %v1341_v33  ;;  %v1338_v56 = vsel %vm1242_vm12, %v4271_v38, %v1290_v7  ;;  %v651_v35 = vmul.f32 %v4250_v36, %v547_v60  ;;  %v669_v61 = vsel %vm572_vm8, %v5484_v25, %v621_v59  ;;  %vm602_vm14 = vcmp.gt.f32.partialorder %v547_v60, 0.0  ;;  %v704_v33 = vld [vmem:[%s5437_s3 + $0x48] sm:$0xff]  ;;  %v707_v29 = vld [vmem:[%s5437_s3 + $0x90] sm:$0xff]  ;;  %v706_v59 = vld [vmem:[%s5437_s3 + $0x58] sm:$0xff] }
 0x159   :  { %3080 = vmatpush3.msra.mxu0 %v656_v49  ;;  %3438 = vmatprep.subr.mxu1 %v1340_v24  ;;  %v653_v38 = vsel %vm556_vm13, %v5483_v27, %v605_v26  ;;  %v700_v58 = vsel %vm603_vm3, %v3327_v8, %v652_v32  ;;  %v650_v3 = vmul.f32 %v4654_v9, %v4250_v36  ;;  %vm601_vm9 = vcmp.gt.f32.partialorder %v4654_v9, 0.0  ;;  %v710_v27 = vld [vmem:[%s5437_s3 + $0xd8] sm:$0xff] }
 0x15a   :  { %3081 = vmatprep.subr.mxu0 %v671_v46  ;;  %3439 = vmatpush3.msra.mxu1 %v1340_v24  ;;  %v649_v20 = vmul.f32 %v4250_v36, %v4691_v14  ;;  %v699_v55 = vsel %vm602_vm14, %v547_v60, %v651_v35  ;;  %vm600_vm10 = vcmp.gt.f32.partialorder %v4691_v14, 0.0  ;;  %v648_v39 = vmul.f32 %v4580_v12, %v4250_v36  ;;  %v3632_v46 = vld [vmem:[%s5435_s1 + $0x28] sm:$0x7]  ;;  %v3634_v32 = vld [vmem:[%s5435_s1 + $0x18] sm:$0xff] }
 0x15b   :  { %3082 = vmatpush3.msra.mxu0 %v655_v47  ;;  %3440 = vmatprep.subr.mxu1 %v1339_v44  ;;  %v698_v5 = vsel %vm601_vm9, %v4654_v9, %v650_v3  ;;  %vm599_vm4 = vcmp.gt.f32.partialorder %v4580_v12, 0.0  ;;  %v647_v40 = vmul.f32 %v4250_v36, %v4617_v16  ;;  %vm598_vm5 = vcmp.gt.f32.partialorder %v4617_v16, 0.0  ;;  %v1706_v47 = vld [vmem:[%s5436_s2 + $0x300] sm:$0xff]  ;;  %v3636_v60 = vld [vmem:[%s5435_s1 + $0x8] sm:$0xff]  ;;  %v1709_v35 = vld [vmem:[%s5436_s2 + $0x318] sm:$0xff] }
 0x15c   :  { %3083 = vmatprep.subr.mxu0 %v670_v57  ;;  %3441 = vmatpush3.msra.mxu1 %v1339_v44  ;;  %v697_v31 = vsel %vm600_vm10, %v4691_v14, %v649_v20  ;;  %v646_v9 = vmul.f32 %v4511_v4, %v4250_v36  ;;  %v696_v52 = vsel %vm599_vm4, %v4580_v12, %v648_v39  ;;  %vm597_vm6 = vcmp.gt.f32.partialorder %v4511_v4, 0.0  ;;  %v702_v14 = vld [vmem:[%s5437_s3 + $0x8] sm:$0xff]  ;;  %v3635_v44 = vld [vmem:[%s5435_s1 + $0x10] sm:$0xff] }
 0x15d   :  { %3084 = vmatpush3.msra.mxu0 %v654_v28  ;;  %3442 = vmatprep.subr.mxu1 %v1338_v56  ;;  %v645_v63 = vmul.f32 %v4250_v36, %v4544_v18  ;;  %v695_v23 = vsel %vm598_vm5, %v4617_v16, %v647_v40  ;;  %vm596_vm15 = vcmp.gt.f32.partialorder %v4544_v18, 0.0  ;;  %v644_v12 = vmul.f32 %v4430_v2, %v4250_v36  ;;  %v705_v16 = vld [vmem:[%s5437_s3 + $0x50] sm:$0xff]  ;;  %v1707_v57 = vld [vmem:[%s5436_s2 + $0x308] sm:$0xff]  ;;  %v3637_v28 = vld [vmem:[%s5435_s1] sm:$0xff] }
 0x15e   :  { %3085 = vmatprep.subr.mxu0 %v669_v61  ;;  %3443 = vmatpush3.msra.mxu1 %v1338_v56  ;;  %v694_v48 = vsel %vm597_vm6, %v4511_v4, %v646_v9  ;;  %vm595_vm11 = vcmp.gt.f32.partialorder %v4430_v2, 0.0  ;;  %v643_v51 = vmul.f32 %v4250_v36, %v4477_v54  ;;  %vm594_vm2 = vcmp.gt.f32.partialorder %v4477_v54, 0.0  ;;  %v1708_v56 = vld [vmem:[%s5436_s2 + $0x310] sm:$0xff]  ;;  %v1710_v61 = vld [vmem:[%s5436_s2 + $0x320] sm:$0xff]  ;;  %v1719_v20 = vld [vmem:[%s5436_s2 + $0x368] sm:$0xff] }
 0x15f   :  { %3086 = vmatpush3.msra.mxu0 %v653_v38  ;;  %3450 = vmatprep.subr.mxu1 %v700_v58  ;;  %v693_v22 = vsel %vm596_vm15, %v4544_v18, %v645_v63  ;;  %v642_v4 = vmul.f32 %v4364_v37, %v4250_v36  ;;  %v692_v15 = vsel %vm595_vm11, %v4430_v2, %v644_v12  ;;  %vm593_vm7 = vcmp.gt.f32.partialorder %v4364_v37, 0.0  ;;  %v708_v18 = vld [vmem:[%s5437_s3 + $0x98] sm:$0xff]  ;;  %v1716_v3 = vld [vmem:[%s5436_s2 + $0x350] sm:$0xff]  ;;  %v1723_v39 = vld [vmem:[%s5436_s2 + $0x388] sm:$0xff] }
 0x160   :  { %3445 = vmatmul.mubr.f32.vlgmr.msra.gmra.mxu1 %v1359_v17  ;;  %1435 = vmatprep.mubr.f32.mxu0 %v1358_v43  ;;  %v641_v8 = vmul.f32 %v4250_v36, %v4395_v30  ;;  %v691_v0 = vsel %vm594_vm2, %v4477_v54, %v643_v51  ;;  %vm592_vm12 = vcmp.gt.f32.partialorder %v4395_v30, 0.0  ;;  %v640_v2 = vmul.f32 %v4304_v34, %v4250_v36  ;;  %v711_v54 = vld [vmem:[%s5437_s3 + $0xe0] sm:$0xff]  ;;  %v1711_v17 = vld [vmem:[%s5436_s2 + $0x328] sm:$0xff]  ;;  %v1712_v43 = vld [vmem:[%s5436_s2 + $0x330] sm:$0xff] }
 0x161   :  { %3451 = vmatpush3.msra.mxu1 %v700_v58  ;;  %3447 = vmatprep.mubr.f32.mxu1 %v1362_v10  ;;  %v690_v1 = vsel %vm593_vm7, %v4364_v37, %v642_v4  ;;  %vm591_vm8 = vcmp.gt.f32.partialorder %v4304_v34, 0.0  ;;  %v639_v7 = vmul.f32 %v4250_v36, %v4334_v6  ;;  %vm590_vm13 = vcmp.gt.f32.partialorder %v4334_v6, 0.0  ;;  %v1713_v38 = vld [vmem:[%s5436_s2 + $0x338] sm:$0xff]  ;;  %v1714_v58 = vld [vmem:[%s5436_s2 + $0x340] sm:$0xff]  ;;  %v1715_v10 = vld [vmem:[%s5436_s2 + $0x348] sm:$0xff] }
 0x162   :  { %3452 = vmatprep.subr.mxu1 %v699_v55  ;;  %1436 = vmatmul.mubr.f32.gmra.mxu0 %v1357_v50  ;;  %v689_v49 = vsel %vm592_vm12, %v4395_v30, %v641_v8  ;;  %v638_v37 = vmul.f32 %v4274_v53, %v4250_v36  ;;  %v688_v24 = vsel %vm591_vm8, %v4304_v34, %v640_v2  ;;  %vm589_vm3 = vcmp.gt.f32.partialorder %v4274_v53, 0.0  ;;  %v1717_v50 = vld [vmem:[%s5436_s2 + $0x358] sm:$0xff]  ;;  %v1727_v40 = vld [vmem:[%s5436_s2 + $0x3a8] sm:$0xff] }
 0x163   :  { %3453 = vmatpush3.msra.mxu1 %v699_v55  ;;  %1440 = vmatprep.mubr.f32.mxu0 %v1361_v45  ;;  %v637_v30 = vmul.f32 %v4250_v36, %v4286_v13  ;;  %v687_v26 = vsel %vm590_vm13, %v4334_v6, %v639_v7  ;;  %vm588_vm14 = vcmp.gt.f32.partialorder %v4286_v13, 0.0  ;;  %v709_v6 = vld [vmem:[%s5437_s3 + $0xa0] sm:$0xff]  ;;  %v1720_v55 = vld [vmem:[%s5436_s2 + $0x370] sm:$0xff]  ;;  %v1729_v9 = vld [vmem:[%s5436_s2 + $0x3b8] sm:$0xff] }
 0x164   :  { %3454 = vmatprep.subr.mxu1 %v698_v5  ;;  %3448 = vmatmul.mubr.f32.gmra.mxu1 %v1365_v42  ;;  %v686_v34 = vsel %vm589_vm3, %v4274_v53, %v638_v37  ;;  %v712_v53 = vld [vmem:[%s5437_s3 + $0xe8] sm:$0xff]  ;;  %v1718_v45 = vld [vmem:[%s5436_s2 + $0x360] sm:$0xff]  ;;  %v1721_v42 = vld [vmem:[%s5436_s2 + $0x378] sm:$0xff] }
 0x165   :  { %3455 = vmatpush3.msra.mxu1 %v698_v5  ;;  %3482 = vmatprep.mubr.f32.mxu1 %v703_v21  ;;  %v685_v25 = vsel %vm588_vm14, %v4286_v13, %v637_v30  ;;  %v3633_v13 = vld [vmem:[%s5435_s1 + $0x20] sm:$0xff]  ;;  %v1724_v5 = vld [vmem:[%s5436_s2 + $0x390] sm:$0xff]  ;;  %v1733_v63 = vld [vmem:[%s5436_s2 + $0x3d8] sm:$0xff] }
 0x166   :  { %3456 = vmatprep.subr.mxu1 %v697_v31  ;;  %1441 = vmatmul.mubr.f32.gmra.mxu0 %v1360_v62  ;;  %v1722_v21 = vld [vmem:[%s5436_s2 + $0x380] sm:$0xff]  ;;  %v1725_v62 = vld [vmem:[%s5436_s2 + $0x398] sm:$0xff]  ;;  %v1735_v12 = vld [vmem:[%s5436_s2 + $0x3e8] sm:$0xff] }
 0x167   :  { %3457 = vmatpush3.msra.mxu1 %v697_v31  ;;  %1445 = vmatprep.mubr.f32.mxu0 %v1364_v11  ;;  %v1726_v11 = vld [vmem:[%s5436_s2 + $0x3a0] sm:$0xff]  ;;  %v1728_v31 = vld [vmem:[%s5436_s2 + $0x3b0] sm:$0xff]  ;;  %v1739_v51 = vld [vmem:[%s5436_s2 + $0x408] sm:$0xff] }
 0x168   :  { %3458 = vmatprep.subr.mxu1 %v696_v52  ;;  %v1741_v4 = vld [vmem:[%s5436_s2 + $0x418] sm:$0xff]  ;;  %v1747_v2 = vld [vmem:[%s5436_s2 + $0x448] sm:$0xff] }
 0x169   :  { %3459 = vmatpush3.msra.mxu1 %v696_v52  ;;  %v1730_v52 = vld [vmem:[%s5436_s2 + $0x3c0] sm:$0xff]  ;;  %v1745_v8 = vld [vmem:[%s5436_s2 + $0x438] sm:$0xff]  ;;  %v1751_v7 = vld [vmem:[%s5436_s2 + $0x468] sm:$0xff] }
 0x16a   :  { %3460 = vmatprep.subr.mxu1 %v695_v23  ;;  %1446 = vmatmul.mubr.f32.gmra.mxu0 %v1363_v41  ;;  %v1731_v41 = vld [vmem:[%s5436_s2 + $0x3c8] sm:$0xff]  ;;  %v1753_v37 = vld [vmem:[%s5436_s2 + $0x478] sm:$0xff] }
 0x16b   :  { %3461 = vmatpush3.msra.mxu1 %v695_v23  ;;  %1600 = vmatprep.mubr.f32.mxu0 %v702_v14  ;;  %v1732_v14 = vld [vmem:[%s5436_s2 + $0x3d0] sm:$0xff]  ;;  %v1734_v23 = vld [vmem:[%s5436_s2 + $0x3e0] sm:$0xff] }
 0x16c   :  { %3462 = vmatprep.subr.mxu1 %v694_v48 }
 0x16d   :  { %3463 = vmatpush3.msra.mxu1 %v694_v48  ;;  %v1736_v48 = vld [vmem:[%s5436_s2 + $0x3f0] sm:$0xff] }
 0x16e   :  { %3464 = vmatprep.subr.mxu1 %v693_v22  ;;  %1601 = vmatmul.mubr.f32.vlgmr.msra.gmra.mxu0 %v701_v19  ;;  %v1737_v19 = vld [vmem:[%s5436_s2 + $0x3f8] sm:$0xff] }
 0x16f   :  { %3465 = vmatpush3.msra.mxu1 %v693_v22  ;;  %1605 = vmatprep.mubr.f32.mxu0 %v705_v16  ;;  %v1738_v16 = vld [vmem:[%s5436_s2 + $0x400] sm:$0xff]  ;;  %v1740_v22 = vld [vmem:[%s5436_s2 + $0x410] sm:$0xff] }
 0x170   :  { %3466 = vmatprep.subr.mxu1 %v692_v15 }
 0x171   :  { %3467 = vmatpush3.msra.mxu1 %v692_v15  ;;  %v1742_v15 = vld [vmem:[%s5436_s2 + $0x420] sm:$0xff] }
 0x172   :  { %3468 = vmatprep.subr.mxu1 %v691_v0  ;;  %1606 = vmatmul.mubr.f32.gmra.mxu0 %v704_v33  ;;  %v1743_v33 = vld [vmem:[%s5436_s2 + $0x428] sm:$0xff] }
 0x173   :  { %3469 = vmatpush3.msra.mxu1 %v691_v0  ;;  %1610 = vmatprep.mubr.f32.mxu0 %v708_v18  ;;  %v1744_v18 = vld [vmem:[%s5436_s2 + $0x430] sm:$0xff]  ;;  %v1746_v0 = vld [vmem:[%s5436_s2 + $0x440] sm:$0xff] }
 0x174   :  { %3470 = vmatprep.subr.mxu1 %v690_v1 }
 0x175   :  { %3471 = vmatpush3.msra.mxu1 %v690_v1  ;;  %v1748_v1 = vld [vmem:[%s5436_s2 + $0x450] sm:$0xff] }
 0x176   :  { %3472 = vmatprep.subr.mxu1 %v689_v49  ;;  %1611 = vmatmul.mubr.f32.gmra.mxu0 %v707_v29  ;;  %v1749_v29 = vld [vmem:[%s5436_s2 + $0x458] sm:$0xff] }
 0x177   :  { %3473 = vmatpush3.msra.mxu1 %v689_v49  ;;  %1615 = vmatprep.mubr.f32.mxu0 %v711_v54  ;;  %v1750_v54 = vld [vmem:[%s5436_s2 + $0x460] sm:$0xff]  ;;  %v1752_v49 = vld [vmem:[%s5436_s2 + $0x470] sm:$0xff] }
 0x178   :  { %3474 = vmatprep.subr.mxu1 %v688_v24 }
 0x179   :  { %3475 = vmatpush3.msra.mxu1 %v688_v24 }
 0x17a   :  { %3476 = vmatprep.subr.mxu1 %v687_v26  ;;  %1616 = vmatmul.mubr.f32.gmra.mxu0 %v710_v27 }
 0x17b   :  { %3477 = vmatpush3.msra.mxu1 %v687_v26 }
 0x17c   :  { %3478 = vmatprep.subr.mxu1 %v686_v34 }
 0x17d   :  { %3479 = vmatpush3.msra.mxu1 %v686_v34 }
 0x17e   :  { %3480 = vmatprep.subr.mxu1 %v685_v25 }
 0x17f   :  { %3481 = vmatpush3.msra.mxu1 %v685_v25 }
 0x180   :  { %3488 = vmatprep.subr.msk.mxu1 %vm247_vm0, %v3632_v46  ;;  %3483 = vmatmul.mubr.f32.vlgmr.msra.gmra.mxu1 %v706_v59 }
 0x181   :  { %3489 = vmatpush3.msk.msra.mxu1 %vm247_vm0, %v3632_v46  ;;  %3485 = vmatprep.mubr.f32.mxu1 %v709_v6  ;;  %v2348_v6 = vld [vmem:[%s5437_s3 + $0x38] sm:$0xff] }
 0x182   :  { %3490 = vmatprep.subr.mxu1 %v3633_v13  ;;  %2423 = vmatprep.mubr.f32.mxu0 %v2348_v6 }
 0x183   :  { %3491 = vmatpush3.msra.mxu1 %v3633_v13 }
 0x184   :  { %3492 = vmatprep.subr.mxu1 %v3634_v32  ;;  %3486 = vmatmul.mubr.f32.gmra.mxu1 %v712_v53 }
 0x185   :  { %3493 = vmatpush3.msra.mxu1 %v3634_v32  ;;  %3500 = vmatprep.mubr.msk.f32.mxu1 %vm102_vm1, %v1706_v47 }
 0x186   :  { %3494 = vmatprep.subr.mxu1 %v3635_v44 }
 0x187   :  { %3495 = vmatpush3.msra.mxu1 %v3635_v44 }
 0x188   :  { %3496 = vmatprep.subr.mxu1 %v3636_v60 }
 0x189   :  { %3497 = vmatpush3.msra.mxu1 %v3636_v60 }
 0x18a   :  { %3498 = vmatprep.subr.mxu1 %v3637_v28 }
 0x18b   :  { %3499 = vmatpush3.msra.mxu1 %v3637_v28 }
 0x18c   :  { %3501 = vmatmul.mubr.msk.f32.vlgmr.msra.gmra.mxu1 %vm102_vm1, %v1707_v57 }
 0x18d   :  { %3503 = vmatprep.mubr.msk.f32.mxu1 %vm102_vm1, %v1708_v56 }
 0x190   :  { %3504 = vmatmul.mubr.msk.f32.gmra.mxu1 %vm102_vm1, %v1709_v35 }
 0x191   :  { %3506 = vmatprep.mubr.msk.f32.mxu1 %vm102_vm1, %v1710_v61 }
 0x194   :  { %3507 = vmatmul.mubr.msk.f32.gmra.mxu1 %vm102_vm1, %v1711_v17 }
 0x195   :  { %3509 = vmatprep.mubr.msk.f32.mxu1 %vm102_vm1, %v1712_v43 }
 0x198   :  { %3510 = vmatmul.mubr.msk.f32.gmra.mxu1 %vm102_vm1, %v1713_v38 }
 0x199   :  { %3512 = vmatprep.mubr.msk.f32.mxu1 %vm102_vm1, %v1714_v58 }
 0x19c   :  { %3513 = vmatmul.mubr.msk.f32.gmra.mxu1 %vm102_vm1, %v1715_v10 }
 0x19d   :  { %3515 = vmatprep.mubr.msk.f32.mxu1 %vm102_vm1, %v1716_v3 }
 0x1a0   :  { %3516 = vmatmul.mubr.msk.f32.gmra.mxu1 %vm102_vm1, %v1717_v50 }
 0x1a1   :  { %3518 = vmatprep.mubr.msk.f32.mxu1 %vm102_vm1, %v1718_v45 }
 0x1a4   :  { %3519 = vmatmul.mubr.msk.f32.gmra.mxu1 %vm102_vm1, %v1719_v20 }
 0x1a5   :  { %3521 = vmatprep.mubr.msk.f32.mxu1 %vm102_vm1, %v1720_v55 }
 0x1a8   :  { %3522 = vmatmul.mubr.msk.f32.gmra.mxu1 %vm102_vm1, %v1721_v42 }
 0x1a9   :  { %3524 = vmatprep.mubr.msk.f32.mxu1 %vm102_vm1, %v1722_v21 }
 0x1ac   :  { %3525 = vmatmul.mubr.msk.f32.gmra.mxu1 %vm102_vm1, %v1723_v39 }
 0x1ad   :  { %3527 = vmatprep.mubr.msk.f32.mxu1 %vm102_vm1, %v1724_v5 }
 0x1b0   :  { %3528 = vmatmul.mubr.msk.f32.gmra.mxu1 %vm102_vm1, %v1725_v62 }
 0x1b1   :  { %3530 = vmatprep.mubr.msk.f32.mxu1 %vm102_vm1, %v1726_v11 }
 0x1b4   :  { %3531 = vmatmul.mubr.msk.f32.gmra.mxu1 %vm102_vm1, %v1727_v40 }
 0x1b5   :  { %3533 = vmatprep.mubr.msk.f32.mxu1 %vm102_vm1, %v1728_v31 }
 0x1b8   :  { %3534 = vmatmul.mubr.msk.f32.gmra.mxu1 %vm102_vm1, %v1729_v9 }
 0x1b9   :  { %3536 = vmatprep.mubr.msk.f32.mxu1 %vm102_vm1, %v1730_v52 }
 0x1bc   :  { %3537 = vmatmul.mubr.msk.f32.gmra.mxu1 %vm102_vm1, %v1731_v41 }
 0x1bd   :  { %3539 = vmatprep.mubr.msk.f32.mxu1 %vm102_vm1, %v1732_v14 }
 0x1c0   :  { %3540 = vmatmul.mubr.msk.f32.gmra.mxu1 %vm102_vm1, %v1733_v63 }
 0x1c1   :  { %3542 = vmatprep.mubr.msk.f32.mxu1 %vm102_vm1, %v1734_v23 }
 0x1c4   :  { %3543 = vmatmul.mubr.msk.f32.gmra.mxu1 %vm102_vm1, %v1735_v12 }
 0x1c5   :  { %3545 = vmatprep.mubr.msk.f32.mxu1 %vm102_vm1, %v1736_v48 }
 0x1c8   :  { %3546 = vmatmul.mubr.msk.f32.gmra.mxu1 %vm102_vm1, %v1737_v19 }
 0x1c9   :  { %3548 = vmatprep.mubr.msk.f32.mxu1 %vm102_vm1, %v1738_v16 }
 0x1cc   :  { %3549 = vmatmul.mubr.msk.f32.gmra.mxu1 %vm102_vm1, %v1739_v51 }
 0x1cd   :  { %3551 = vmatprep.mubr.msk.f32.mxu1 %vm102_vm1, %v1740_v22 }
 0x1d0   :  { %3552 = vmatmul.mubr.msk.f32.gmra.mxu1 %vm102_vm1, %v1741_v4 }
 0x1d1   :  { %3554 = vmatprep.mubr.msk.f32.mxu1 %vm102_vm1, %v1742_v15 }
 0x1d4   :  { %3555 = vmatmul.mubr.msk.f32.gmra.mxu1 %vm102_vm1, %v1743_v33 }
 0x1d5   :  { %3557 = vmatprep.mubr.msk.f32.mxu1 %vm102_vm1, %v1744_v18 }
 0x1d8   :  { %3558 = vmatmul.mubr.msk.f32.gmra.mxu1 %vm102_vm1, %v1745_v8 }
 0x1d9   :  { %3560 = vmatprep.mubr.msk.f32.mxu1 %vm102_vm1, %v1746_v0 }
 0x1dc   :  { %3561 = vmatmul.mubr.msk.f32.gmra.mxu1 %vm102_vm1, %v1747_v2 }
 0x1dd   :  { %3563 = vmatprep.mubr.msk.f32.mxu1 %vm102_vm1, %v1748_v1 }
 0x1e0   :  { %3564 = vmatmul.mubr.msk.f32.gmra.mxu1 %vm102_vm1, %v1749_v29 }
 0x1e1   :  { %3566 = vmatprep.mubr.msk.f32.mxu1 %vm102_vm1, %v1750_v54 }
 0x1e4   :  { %3567 = vmatmul.mubr.msk.f32.gmra.mxu1 %vm102_vm1, %v1751_v7 }
 0x1e5   :  { %3569 = vmatprep.mubr.msk.f32.mxu1 %vm102_vm1, %v1752_v49 }
 0x1e8   :  { %3570 = vmatmul.mubr.msk.f32.gmra.mxu1 %vm102_vm1, %v1753_v37 }
 0x200   :  { %v3023_v24 = vpop.f32.mrf.mxu0 }
 0x202   :  { %v3024_v27 = vpop.f32.mrf.mxu0 }
 0x203   :  { %v3025_v35 = vadd.f32 %v3024_v27, %v3023_v24 }
 0x220   :  { %v3446_v47 = vpop.f32.mrf.mxu1 }
 0x222   :  { %v3026_v30 = vpop.f32.mrf.mxu0  ;;  %v1517_v60 = vpop.f32.mrf.mxu1 }
 0x223   :  { %v1518_v3 = vadd.f32 %v3025_v35, %v1517_v60 }
 0x224   :  { %v3027_v26 = vpop.f32.mrf.mxu0  ;;  %v3449_v28 = vpop.f32.mrf.mxu1 }
 0x225   :  { %v3028_v61 = vadd.f32 %v3027_v26, %v3026_v30 }
 0x226   :  { %v3029_v34 = vpop.f32.mrf.mxu0  ;;  %v1527_v58 = vpop.f32.mrf.mxu1 }
 0x227   :  { %v1523_v50 = vadd.f32 %v3446_v47, %v3028_v61 }
 0x228   :  { %v3030_v25 = vpop.f32.mrf.mxu0 }
 0x229   :  { %v3031_v45 = vadd.f32 %v3030_v25, %v3029_v34 }
 0x22a   :  { %v3032_v59 = vpop.f32.mrf.mxu0 }
 0x22b   :  { %v1528_v5 = vadd.f32 %v3031_v45, %v1527_v58 }
 0x22c   :  { %v3033_v46 = vpop.f32.mrf.mxu0 }
 0x22d   :  { %v3034_v43 = vadd.f32 %v3033_v46, %v3032_v59 }
 0x22e   :  { %v3087_v53 = vpop.f32.mrf.mxu0 }
 0x22f   :  { %v1533_v55 = vadd.f32 %v3449_v28, %v3034_v43 }
 0x230   :  { %v3088_v13 = vpop.f32.mrf.mxu0 }
 0x231   :  { %v3089_v20 = vadd.f32 %v3088_v13, %v3087_v53 }
 0x232   :  { %v3090_v32 = vpop.f32.mrf.mxu0 }
 0x233   :  { %v1603_v62 = vadd.f32 %v3089_v20, %v1518_v3 }
 0x234   :  { %v3091_v44 = vpop.f32.mrf.mxu0 }
 0x235   :  { %v3092_v38 = vadd.f32 %v3091_v44, %v3090_v32 }
 0x236   :  { %v3093_v57 = vpop.f32.mrf.mxu0 }
 0x237   :  { %v1608_v42 = vadd.f32 %v3092_v38, %v1523_v50 }
 0x238   :  { %v3094_v56 = vpop.f32.mrf.mxu0 }
 0x239   :  { %v3095_v11 = vadd.f32 %v3094_v56, %v3093_v57 }
 0x23a   :  { %v3096_v17 = vpop.f32.mrf.mxu0 }
 0x23b   :  { %v1613_v14 = vadd.f32 %v3095_v11, %v1528_v5 }
 0x23c   :  { %v3097_v10 = vpop.f32.mrf.mxu0 }
 0x23d   :  { %v3098_v21 = vadd.f32 %v3097_v10, %v3096_v17 }
 0x23f   :  { %v1618_v9 = vadd.f32 %v3098_v21, %v1533_v55 }
 0x240   :  { %v3484_v39 = vpop.f32.mrf.mxu1 }
 0x241   :  { %v5114_v40 = vadd.f32 %v3484_v39, %v1608_v42 }
 0x242   :  { %v1687_v31 = vpop.f32.mrf.mxu1 }
 0x243   :  { %v5116_v52 = vadd.f32 %v1687_v31, %v1603_v62 }
 0x244   :  { %v3487_v41 = vpop.f32.mrf.mxu1 }
 0x245   :  { %v5118_v63 = vadd.f32 %v3487_v41, %v1618_v9 }
 0x246   :  { %v1697_v23 = vpop.f32.mrf.mxu1 }
 0x247   :  { %v5120_v12 = vadd.f32 %v1697_v23, %v1613_v14 }
 0x24c   :  { %v5122_v48 = vpop.f32.mrf.mxu1 }
 0x24e   :  { %v5124_v19 = vpop.f32.mrf.mxu1 }
 0x250   :  { %v5126_v16 = vpop.f32.mrf.mxu1 }
 0x252   :  { %v5128_v51 = vpop.f32.mrf.mxu1 }
 0x254   :  { %v5130_v22 = vpop.f32.mrf.mxu1 }
 0x256   :  { %v5132_v4 = vpop.f32.mrf.mxu1 }
 0x258   :  { %v5134_v15 = vpop.f32.mrf.mxu1 }
 0x25a   :  { %v5136_v33 = vpop.f32.mrf.mxu1 }
 0x25c   :  { %v5138_v18 = vpop.f32.mrf.mxu1 }
 0x25d   :  { %v2260_v23 = vmul.f32 %v5138_v18, %v4250_v36  ;;  %vm2212_vm13 = vcmp.gt.f32.partialorder %v5138_v18, 0.0 }
 0x25e   :  { %v5140_v8 = vpop.f32.mrf.mxu1 }
 0x25f   :  { %vm2211_vm14 = vcmp.gt.f32.partialorder %v5140_v8, 0.0 }
 0x260   :  { %v5142_v0 = vpop.f32.mrf.mxu1 }
 0x261   :  { %v2262_v42 = vmul.f32 %v5142_v0, %v4250_v36  ;;  %vm2214_vm2 = vcmp.gt.f32.partialorder %v5142_v0, 0.0 }
 0x262   :  { %v5144_v2 = vpop.f32.mrf.mxu1 }
 0x263   :  { %v2261_v11 = vmul.f32 %v5144_v2, %v4250_v36  ;;  %vm2213_vm12 = vcmp.gt.f32.partialorder %v5144_v2, 0.0 }
 0x264   :  { %v3520_v1 = vpop.f32.mrf.mxu1 }
 0x265   :  { %v2264_v17 = vmul.f32 %v3520_v1, %v4250_v36  ;;  %vm2216_vm5 = vcmp.gt.f32.partialorder %v3520_v1, 0.0 }
 0x266   :  { %v2024_v29 = vpop.f32.mrf.mxu1 }
 0x267   :  { %v2263_v3 = vmul.f32 %v2024_v29, %v4250_v36  ;;  %vm2215_vm15 = vcmp.gt.f32.partialorder %v2024_v29, 0.0  ;;  %v2312_v39 = vsel %vm2216_vm5, %v3520_v1, %v2264_v17  ;;  %vm2208_vm5 = vcmp.gt.f32.partialorder %v5130_v22, 0.0 }
 0x268   :  { %v3523_v54 = vpop.f32.mrf.mxu1 }
 0x269   :  { %v2266_v32 = vmul.f32 %v3523_v54, %v4250_v36  ;;  %vm2218_vm0 = vcmp.gt.f32.partialorder %v3523_v54, 0.0  ;;  %v2311_v9 = vsel %vm2215_vm15, %v2024_v29, %v2263_v3  ;;  %v2310_v29 = vsel %vm2214_vm2, %v5142_v0, %v2262_v42 }
 0x26a   :  { %v2034_v7 = vpop.f32.mrf.mxu1  ;;  %v2309_v0 = vsel %vm2213_vm12, %v5144_v2, %v2261_v11  ;;  %v2308_v2 = vsel %vm2212_vm13, %v5138_v18, %v2260_v23  ;;  %vm2207_vm15 = vcmp.gt.f32.partialorder %v5132_v4, 0.0  ;;  %v2254_v3 = vmul.f32 %v5126_v16, %v4250_v36 }
 0x26b   :  { %vm2217_vm9 = vcmp.gt.f32.partialorder %v2034_v7, 0.0  ;;  %v2265_v57 = vmul.f32 %v2034_v7, %v4250_v36  ;;  %v2314_v38 = vsel %vm2218_vm0, %v3523_v54, %v2266_v32  ;;  %v2258_v32 = vmul.f32 %v5134_v15, %v4250_v36 }
 0x26c   :  { %v5146_v49 = vpop.f32.mrf.mxu1  ;;  %vm2206_vm2 = vcmp.gt.f32.partialorder %v5126_v16, 0.0  ;;  %vm2205_vm12 = vcmp.gt.f32.partialorder %v5128_v51, 0.0  ;;  %vm2204_vm13 = vcmp.gt.f32.partialorder %v5122_v48, 0.0 }
 0x26d   :  { %v2313_v45 = vsel %vm2217_vm9, %v2034_v7, %v2265_v57  ;;  %v2257_v57 = vmul.f32 %v5136_v33, %v4250_v36 }
 0x26e   :  { %v5148_v37 = vpop.f32.mrf.mxu1 }
 0x26f   :  { %v2267_v11 = vmul.f32 %v5148_v37, %v4250_v36 }
 0x270   :  { %v5150_v24 = vpop.f32.mrf.mxu1 }
 0x272   :  { %v5152_v27 = vpop.f32.mrf.mxu1 }
 0x274   :  { %v5154_v30 = vpop.f32.mrf.mxu1 }
 0x276   :  { %v5156_v26 = vpop.f32.mrf.mxu1 }
 0x277   :  { %v2271_v17 = vmul.f32 %v5156_v26, %v4250_v36 }
 0x278   :  { %v5158_v34 = vpop.f32.mrf.mxu1 }
 0x279   :  { %vm2226_vm0 = vcmp.gt.f32.partialorder %v5158_v34, 0.0 }
 0x27a   :  { %v5160_v25 = vpop.f32.mrf.mxu1 }
 0x27b   :  { %vm2225_vm9 = vcmp.gt.f32.partialorder %v5160_v25, 0.0 }
 0x27c   :  { %v5162_v59 = vpop.f32.mrf.mxu1 }
 0x27d   :  { %v2276_v41 = vmul.f32 %v5162_v59, %v4250_v36  ;;  %vm2228_vm8 = vcmp.gt.f32.partialorder %v5162_v59, 0.0 }
 0x27e   :  { %v5164_v6 = vpop.f32.mrf.mxu1 }
 0x27f   :  { %v2275_v54 = vmul.f32 %v5164_v6, %v4250_v36  ;;  %vm2227_vm3 = vcmp.gt.f32.partialorder %v5164_v6, 0.0 }
 0x280   :  { %v3541_v46 = vpop.f32.mrf.mxu1 }
 0x281   :  { %v2278_v20 = vmul.f32 %v3541_v46, %v4250_v36  ;;  %vm2230_vm11 = vcmp.gt.f32.partialorder %v3541_v46, 0.0 }
 0x282   :  { %v2094_v53 = vpop.f32.mrf.mxu1 }
 0x283   :  { %v2277_v5 = vmul.f32 %v2094_v53, %v4250_v36  ;;  %vm2229_vm7 = vcmp.gt.f32.partialorder %v2094_v53, 0.0  ;;  %v2326_v14 = vsel %vm2230_vm11, %v3541_v46, %v2278_v20  ;;  %v2259_v46 = vmul.f32 %v5140_v8, %v4250_v36 }
 0x284   :  { %v3544_v13 = vpop.f32.mrf.mxu1  ;;  %vm2222_vm11 = vcmp.gt.f32.partialorder %v5150_v24, 0.0  ;;  %v2269_v20 = vmul.f32 %v5152_v27, %v4250_v36 }
 0x285   :  { %v2280_v56 = vmul.f32 %v3544_v13, %v4250_v36  ;;  %vm2232_vm4 = vcmp.gt.f32.partialorder %v3544_v13, 0.0  ;;  %v2325_v7 = vsel %vm2229_vm7, %v2094_v53, %v2277_v5  ;;  %v2324_v53 = vsel %vm2228_vm8, %v5162_v59, %v2276_v41 }
 0x286   :  { %v2104_v47 = vpop.f32.mrf.mxu1  ;;  %v2323_v59 = vsel %vm2227_vm3, %v5164_v6, %v2275_v54  ;;  %v2307_v18 = vsel %vm2211_vm14, %v5140_v8, %v2259_v46  ;;  %vm2221_vm7 = vcmp.gt.f32.partialorder %v5152_v27, 0.0  ;;  %v2252_v5 = vmul.f32 %v5122_v48, %v4250_v36 }
 0x287   :  { %v2279_v58 = vmul.f32 %v2104_v47, %v4250_v36  ;;  %vm2231_vm6 = vcmp.gt.f32.partialorder %v2104_v47, 0.0  ;;  %v2328_v55 = vsel %vm2232_vm4, %v3544_v13, %v2280_v56  ;;  %v2272_v56 = vmul.f32 %v5154_v30, %v4250_v36 }
 0x288   :  { %v3547_v44 = vpop.f32.mrf.mxu1  ;;  %vm2224_vm4 = vcmp.gt.f32.partialorder %v5154_v30, 0.0  ;;  %vm2220_vm8 = vcmp.gt.f32.partialorder %v5146_v49, 0.0  ;;  %vm2219_vm3 = vcmp.gt.f32.partialorder %v5148_v37, 0.0  ;;  %vm2203_vm14 = vcmp.gt.f32.partialorder %v5124_v19, 0.0 }
 0x289   :  { %vm2234_vm1 = vcmp.gt.f32.partialorder %v3547_v44, 0.0  ;;  %v2282_v60 = vmul.f32 %v3547_v44, %v4250_v36  ;;  %v2327_v62 = vsel %vm2231_vm6, %v2104_v47, %v2279_v58  ;;  %v2274_v47 = vmul.f32 %v5158_v34, %v4250_v36 }
 0x28a   :  { %v2114_v28 = vpop.f32.mrf.mxu1  ;;  %vm2223_vm6 = vcmp.gt.f32.partialorder %v5156_v26, 0.0  ;;  %v2315_v54 = vsel %vm2219_vm3, %v5148_v37, %v2267_v11 }
 0x28b   :  { %vm2233_vm10 = vcmp.gt.f32.partialorder %v2114_v28, 0.0  ;;  %v2281_v35 = vmul.f32 %v2114_v28, %v4250_v36  ;;  %v2330_v61 = vsel %vm2234_vm1, %v3547_v44, %v2282_v60  ;;  %vm2210_vm1 = vcmp.gt.f32.partialorder %v5134_v15, 0.0 }
 0x28c   :  { %v5172_v43 = vpop.f32.mrf.mxu1  ;;  %3173 = vmatprep.subr.mxu0 %v2330_v61  ;;  %v2273_v60 = vmul.f32 %v5160_v25, %v4250_v36  ;;  %v2322_v6 = vsel %vm2226_vm0, %v5158_v34, %v2274_v47  ;;  %v2306_v8 = vsel %vm2210_vm1, %v5134_v15, %v2258_v32  ;;  %v2354_v32 = vld [vmem:[%s5437_s3 + $0xc8] sm:$0xff] }
 0x28d   :  { %3174 = vmatpush3.msra.mxu0 %v2314_v38  ;;  %v2329_v10 = vsel %vm2233_vm10, %v2114_v28, %v2281_v35  ;;  %vm2209_vm10 = vcmp.gt.f32.partialorder %v5136_v33, 0.0  ;;  %v2256_v35 = vmul.f32 %v5130_v22, %v4250_v36  ;;  %v2255_v38 = vmul.f32 %v5132_v4, %v4250_v36 }
 0x28e   :  { %v5176_v50 = vpop.f32.mrf.mxu1  ;;  %3175 = vmatprep.subr.mxu0 %v2329_v10  ;;  %v2321_v34 = vsel %vm2225_vm9, %v5160_v25, %v2273_v60  ;;  %v2305_v15 = vsel %vm2209_vm10, %v5136_v33, %v2257_v57  ;;  %v2270_v10 = vmul.f32 %v5150_v24, %v4250_v36  ;;  %v2320_v25 = vsel %vm2224_vm4, %v5154_v30, %v2272_v56  ;;  %v2357_v56 = vld [vmem:[%s5437_s3 + $0x110] sm:$0xff] }
 0x28f   :  { %3176 = vmatpush3.msra.mxu0 %v2313_v45  ;;  %v2304_v33 = vsel %vm2208_vm5, %v5130_v22, %v2256_v35  ;;  %v2319_v30 = vsel %vm2223_vm6, %v5156_v26, %v2271_v17  ;;  %v2303_v22 = vsel %vm2207_vm15, %v5132_v4, %v2255_v38  ;;  %v2302_v4 = vsel %vm2206_vm2, %v5126_v16, %v2254_v3  ;;  %v2349_v38 = vld [vmem:[%s5437_s3 + $0x40] sm:$0xff] }
 0x290   :  { %v5183_v21 = vpop.f32.mrf.mxu1  ;;  %3177 = vmatprep.subr.mxu0 %v2328_v55  ;;  %v2253_v55 = vmul.f32 %v5128_v51, %v4250_v36  ;;  %v2318_v26 = vsel %vm2222_vm11, %v5150_v24, %v2270_v10  ;;  %v2317_v24 = vsel %vm2221_vm7, %v5152_v27, %v2269_v20  ;;  %v2300_v27 = vsel %vm2204_vm13, %v5122_v48, %v2252_v5  ;;  %v2632_v5 = vld [vmem:[#allocation2] sm:$0x1] }
 0x291   :  { %3178 = vmatpush3.msra.mxu0 %v2312_v39  ;;  %v2268_v39 = vmul.f32 %v5146_v49, %v4250_v36  ;;  %vm2236_vm3 = vcmp.gt.f32.partialorder %v5172_v43, 0.0 }
 0x292   :  { %v5191_v31 = vpop.f32.mrf.mxu1  ;;  %3179 = vmatprep.subr.mxu0 %v2327_v62  ;;  %v2301_v16 = vsel %vm2205_vm12, %v5128_v51, %v2253_v55 }
 0x293   :  { %3180 = vmatpush3.msra.mxu0 %v2311_v9  ;;  %v2251_v9 = vmul.f32 %v5124_v19, %v4250_v36  ;;  %vm2237_vm13 = vcmp.gt.f32.partialorder %v5191_v31, 0.0 }
 0x294   :  { %v5201_v1 = vpop.f32.mrf.mxu1  ;;  %3181 = vmatprep.subr.mxu0 %v2326_v14  ;;  %v2316_v14 = vsel %vm2220_vm8, %v5146_v49, %v2268_v39  ;;  %v2351_v49 = vld [vmem:[%s5437_s3 + $0x80] sm:$0xff]  ;;  %vm2238_vm8 = vcmp.gt.f32.partialorder %v5183_v21, 0.0 }
 0x295   :  { %3182 = vmatpush3.msra.mxu0 %v2310_v29  ;;  %v2299_v46 = vsel %vm2203_vm14, %v5124_v19, %v2251_v9  ;;  %v2350_v19 = vld [vmem:[%s5437_s3 + $0x78] sm:$0xff]  ;;  %vm2240_vm7 = vcmp.gt.f32.partialorder %v5201_v1, 0.0  ;;  %vm2235_vm14 = vcmp.gt.f32.partialorder %v5176_v50, 0.0 }
 0x296   :  { %v5213_v13 = vpop.f32.mrf.mxu1  ;;  %3183 = vmatprep.subr.mxu0 %v2325_v7  ;;  %v2347_v7 = vld [vmem:[%s5437_s3 + $0x30] sm:$0xff] }
 0x297   :  { %3184 = vmatpush3.msra.mxu0 %v2309_v0  ;;  %vm2239_vm12 = vcmp.gt.f32.partialorder %v5213_v13, 0.0 }
 0x298   :  { %v5227_v44 = vpop.f32.mrf.mxu1  ;;  %3185 = vmatprep.subr.mxu0 %v2324_v53 }
 0x299   :  { %3186 = vmatpush3.msra.mxu0 %v2308_v2  ;;  %vm2242_vm11 = vcmp.gt.f32.partialorder %v5227_v44, 0.0 }
 0x29a   :  { %v5241_v28 = vpop.f32.mrf.mxu1  ;;  %3187 = vmatprep.subr.mxu0 %v2323_v59 }
 0x29b   :  { %3188 = vmatpush3.msra.mxu0 %v2307_v18  ;;  %v2353_v18 = vld [vmem:[%s5437_s3 + $0xc0] sm:$0xff]  ;;  %vm2241_vm2 = vcmp.gt.f32.partialorder %v5241_v28, 0.0 }
 0x29c   :  { %v5255_v61 = vpop.f32.mrf.mxu1  ;;  %3189 = vmatprep.subr.mxu0 %v2322_v6 }
 0x29d   :  { %3190 = vmatpush3.msra.mxu0 %v2306_v8  ;;  %v2292_v6 = vmul.f32 %v5255_v61, %v4250_v36  ;;  %vm2244_vm6 = vcmp.gt.f32.partialorder %v5255_v61, 0.0 }
 0x29e   :  { %v5269_v58 = vpop.f32.mrf.mxu1  ;;  %3191 = vmatprep.subr.mxu0 %v2321_v34  ;;  %v2356_v34 = vld [vmem:[%s5437_s3 + $0x108] sm:$0xff] }
 0x29f   :  { %3192 = vmatpush3.msra.mxu0 %v2305_v15  ;;  %v2291_v8 = vmul.f32 %v5269_v58, %v4250_v36  ;;  %vm2243_vm15 = vcmp.gt.f32.partialorder %v5269_v58, 0.0  ;;  %v2290_v15 = vmul.f32 %v5227_v44, %v4250_v36  ;;  %v2340_v10 = vsel %vm2244_vm6, %v5255_v61, %v2292_v6 }
 0x2a0   :  { %v5283_v45 = vpop.f32.mrf.mxu1  ;;  %3193 = vmatprep.subr.mxu0 %v2320_v25  ;;  %v2289_v25 = vmul.f32 %v5241_v28, %v4250_v36 }
 0x2a1   :  { %3194 = vmatpush3.msra.mxu0 %v2304_v33  ;;  %v2294_v2 = vmul.f32 %v5283_v45, %v4250_v36  ;;  %vm2246_vm4 = vcmp.gt.f32.partialorder %v5283_v45, 0.0  ;;  %v2339_v3 = vsel %vm2243_vm15, %v5269_v58, %v2291_v8  ;;  %v2338_v61 = vsel %vm2242_vm11, %v5227_v44, %v2290_v15 }
 0x2a2   :  { %v5297_v42 = vpop.f32.mrf.mxu1  ;;  %3195 = vmatprep.subr.mxu0 %v2319_v30  ;;  %v2287_v33 = vmul.f32 %v5213_v13, %v4250_v36  ;;  %v2337_v20 = vsel %vm2241_vm2, %v5241_v28, %v2289_v25  ;;  %v2286_v58 = vmul.f32 %v5183_v21, %v4250_v36  ;;  %v2285_v44 = vmul.f32 %v5191_v31, %v4250_v36 }
 0x2a3   :  { %3196 = vmatpush3.msra.mxu0 %v2303_v22  ;;  %v2293_v59 = vmul.f32 %v5297_v42, %v4250_v36  ;;  %vm2245_vm5 = vcmp.gt.f32.partialorder %v5297_v42, 0.0  ;;  %v2342_v35 = vsel %vm2246_vm4, %v5283_v45, %v2294_v2  ;;  %v2288_v45 = vmul.f32 %v5201_v1, %v4250_v36 }
 0x2a4   :  { %v3568_v62 = vpop.f32.mrf.mxu1  ;;  %3197 = vmatprep.subr.mxu0 %v2318_v26  ;;  %v2335_v55 = vsel %vm2239_vm12, %v5213_v13, %v2287_v33  ;;  %v2284_v28 = vmul.f32 %v5172_v43, %v4250_v36  ;;  %v2333_v22 = vsel %vm2237_vm13, %v5191_v31, %v2285_v44  ;;  %v3675_v31 = vmov 0.0  }
 0x2a5   :  { %3198 = vmatpush3.msra.mxu0 %v2302_v4  ;;  %v2296_v48 = vmul.f32 %v3568_v62, %v4250_v36  ;;  %vm2248_vm9 = vcmp.gt.f32.partialorder %v3568_v62, 0.0  ;;  %v2341_v17 = vsel %vm2245_vm5, %v5297_v42, %v2293_v59  ;;  %v2336_v30 = vsel %vm2240_vm7, %v5201_v1, %v2288_v45 }
 0x2a6   :  { %v2184_v41 = vpop.f32.mrf.mxu1  ;;  %3199 = vmatprep.subr.mxu0 %v2317_v24  ;;  %v2334_v42 = vsel %vm2238_vm8, %v5183_v21, %v2286_v58  ;;  %v2283_v1 = vmul.f32 %v5176_v50, %v4250_v36  ;;  %v2332_v13 = vsel %vm2236_vm3, %v5172_v43, %v2284_v28  ;;  %v2352_v21 = vld [vmem:[%s5437_s3 + $0x88] sm:$0xff]  ;;  %v2358_v43 = vld [vmem:[%s5437_s3 + $0x118] sm:$0xff]  ;;  %v3677_v26 = vmov 0  }
 0x2a7   :  { %3200 = vmatpush3.msra.mxu0 %v2301_v16  ;;  %v2295_v37 = vmul.f32 %v2184_v41, %v4250_v36  ;;  %vm2247_vm10 = vcmp.gt.f32.partialorder %v2184_v41, 0.0  ;;  %v2344_v60 = vsel %vm2248_vm9, %v3568_v62, %v2296_v48  ;;  %3631 = vset.pattern.permute.xlu0 %v3677_v26  ;;  %vm2553_vm5 = vcmask 261120  }
 0x2a8   :  { %v3571_v23 = vpop.f32.mrf.mxu1  ;;  %3201 = vmatprep.subr.mxu0 %v2316_v14  ;;  %v2331_v39 = vsel %vm2235_vm14, %v5176_v50, %v2283_v1  ;;  %v2547_v50 = vld [vmem:[%s5439_s5] sm:$0xff]  ;;  %vm2642_vm15 = vcmask 64512  }
 0x2a9   :  { %vm2250_vm0 = vcmp.gt.f32.partialorder %v3571_v23, 0.0  ;;  %v2298_v29 = vmul.f32 %v3571_v23, %v4250_v36  ;;  %3202 = vmatpush3.msra.mxu0 %v2300_v27  ;;  %v2343_v57 = vsel %vm2247_vm10, %v2184_v41, %v2295_v37  ;;  %2550 = vperm.xlu0 %3631, %v2547_v50  }
 0x2aa   :  { %v2194_v51 = vpop.f32.mrf.mxu1  ;;  %3203 = vmatprep.subr.mxu0 %v2315_v54 }
 0x2ab   :  { %vm2249_vm1 = vcmp.gt.f32.partialorder %v2194_v51, 0.0  ;;  %v2297_v0 = vmul.f32 %v2194_v51, %v4250_v36  ;;  %3204 = vmatpush3.msra.mxu0 %v2299_v46  ;;  %v2346_v47 = vsel %vm2250_vm0, %v3571_v23, %v2298_v29  ;;  %v2355_v36 = vld [vmem:[%s5437_s3 + $0xd0] sm:$0xff]  ;;  %vm3676_vm0 = vmmov 0   ;;  %s2732_s3 = sld [smem:[#allocation3 + $0x1]] }
 0x2ac   :  { %3572 = vmatprep.subr.mxu0 %v2346_v47  ;;  %2424 = vmatmul.mubr.f32.vlgmr.msra.gmra.mxu0 %v2347_v7 }
 0x2ad   :  { %3573 = vmatpush3.msra.mxu0 %v2346_v47  ;;  %v2345_v53 = vsel %vm2249_vm1, %v2194_v51, %v2297_v0  ;;  %2428 = vmatprep.mubr.f32.mxu0 %v2351_v49 }
 0x2ae   :  { %3574 = vmatprep.subr.mxu0 %v2345_v53  ;;  %2635 = vperm.xlu0 %3631, %v2632_v5  }
 0x2af   :  { %3575 = vmatpush3.msra.mxu0 %v2345_v53 }
 0x2b0   :  { %3576 = vmatprep.subr.mxu0 %v2344_v60  ;;  %2429 = vmatmul.mubr.f32.gmra.mxu0 %v2350_v19 }
 0x2b1   :  { %3577 = vmatpush3.msra.mxu0 %v2344_v60  ;;  %2433 = vmatprep.mubr.f32.mxu0 %v2354_v32  ;;  %v2537_v32 = vstv %s2732_s3 }
 0x2b2   :  { %3578 = vmatprep.subr.mxu0 %v2343_v57 }
 0x2b3   :  { %3579 = vmatpush3.msra.mxu0 %v2343_v57 }
 0x2b4   :  { %3580 = vmatprep.subr.mxu0 %v2342_v35  ;;  %2434 = vmatmul.mubr.f32.gmra.mxu0 %v2353_v18 }
 0x2b5   :  { %3581 = vmatpush3.msra.mxu0 %v2342_v35  ;;  %2438 = vmatprep.mubr.f32.mxu0 %v2357_v56 }
 0x2b6   :  { %3582 = vmatprep.subr.mxu0 %v2341_v17 }
 0x2b7   :  { %3583 = vmatpush3.msra.mxu0 %v2341_v17  ;;  %v2628_v17 = vstv %s2733_s10 }
 0x2b8   :  { %3584 = vmatprep.subr.mxu0 %v2340_v10  ;;  %2439 = vmatmul.mubr.f32.gmra.mxu0 %v2356_v34 }
 0x2b9   :  { %3585 = vmatpush3.msra.mxu0 %v2340_v10  ;;  %3604 = vmatprep.mubr.f32.mxu0 %v2349_v38  ;;  %v2631_v10 = vld [vmem:[%s5440_s6] sm:$0x1] }
 0x2ba   :  { %3586 = vmatprep.subr.mxu0 %v2339_v3 }
 0x2bb   :  { %3587 = vmatpush3.msra.mxu0 %v2339_v3  ;;  %v2638_v3 = vlaneseq }
 0x2bc   :  { %3588 = vmatprep.subr.mxu0 %v2338_v61 }
 0x2bd   :  { %3589 = vmatpush3.msra.mxu0 %v2338_v61  ;;  %v2639_v45 = vshrl.u32 %v2638_v3, 7 }
 0x2be   :  { %3590 = vmatprep.subr.mxu0 %v2337_v20 }
 0x2bf   :  { %3591 = vmatpush3.msra.mxu0 %v2337_v20  ;;  %v2640_v61 = vsub.s32 0, %v2639_v45 }
 0x2c0   :  { %3592 = vmatprep.subr.mxu0 %v2336_v30 }
 0x2c1   :  { %3593 = vmatpush3.msra.mxu0 %v2336_v30 }
 0x2c2   :  { %3594 = vmatprep.subr.mxu0 %v2335_v55 }
 0x2c3   :  { %3595 = vmatpush3.msra.mxu0 %v2335_v55 }
 0x2c4   :  { %3596 = vmatprep.subr.mxu0 %v2334_v42 }
 0x2c5   :  { %3597 = vmatpush3.msra.mxu0 %v2334_v42 }
 0x2c6   :  { %3598 = vmatprep.subr.mxu0 %v2333_v22 }
 0x2c7   :  { %3599 = vmatpush3.msra.mxu0 %v2333_v22 }
 0x2c8   :  { %3600 = vmatprep.subr.mxu0 %v2332_v13 }
 0x2c9   :  { %3601 = vmatpush3.msra.mxu0 %v2332_v13 }
 0x2ca   :  { %3602 = vmatprep.subr.mxu0 %v2331_v39 }
 0x2cb   :  { %3603 = vmatpush3.msra.mxu0 %v2331_v39 }
 0x2cc   :  { %3605 = vmatmul.mubr.f32.vlgmr.msra.gmra.mxu0 %v2352_v21  ;;  %3610 = vmatprep.subr.mxu0 %v3675_v31 }
 0x2cd   :  { %3607 = vmatprep.mubr.f32.mxu0 %v2355_v36 }
 0x2d0   :  { %3608 = vmatmul.mubr.f32.gmra.mxu0 %v2358_v43 }
 0x2d1   :  { %3618 = vmatprep.mubr.msk.f32.mxu0 %vm3676_vm0, %v3675_v31 }
 0x36c   :  { %v3205_v62 = vpop.f32.mrf.mxu0 }
 0x36e   :  { %v3206_v4 = vpop.f32.mrf.mxu0 }
 0x36f   :  { %v3207_v54 = vadd.f32 %v3206_v4, %v3205_v62 }
 0x370   :  { %v3208_v11 = vpop.f32.mrf.mxu0 }
 0x372   :  { %v3209_v24 = vpop.f32.mrf.mxu0 }
 0x373   :  { %v3210_v27 = vadd.f32 %v3209_v24, %v3208_v11 }
 0x374   :  { %v3211_v9 = vpop.f32.mrf.mxu0 }
 0x376   :  { %v3212_v41 = vpop.f32.mrf.mxu0 }
 0x377   :  { %v3213_v49 = vadd.f32 %v3212_v41, %v3211_v9 }
 0x378   :  { %v3214_v16 = vpop.f32.mrf.mxu0 }
 0x37a   :  { %v3215_v14 = vpop.f32.mrf.mxu0 }
 0x37b   :  { %v3216_v7 = vadd.f32 %v3215_v14, %v3214_v16 }
 0x38c   :  { %v3606_v23 = vpop.f32.mrf.mxu0 }
 0x38d   :  { %v2516_v51 = vadd.f32 %v3606_v23, %v3210_v27 }
 0x38e   :  { %v2510_v29 = vpop.f32.mrf.mxu0 }
 0x38f   :  { %v2511_v48 = vadd.f32 %v3207_v54, %v2510_v29  ;;  %v2530_v37 = vadd.f32 %v2516_v51, %v5114_v40 }
 0x390   :  { %v3609_v46 = vpop.f32.mrf.mxu0 }
 0x391   :  { %v2526_v0 = vadd.f32 %v3609_v46, %v3216_v7  ;;  %v2529_v2 = vadd.f32 %v2511_v48, %v5116_v52  ;;  %v2539_v57 = vmul.f32 %v2537_v32, %v2530_v37  ;;  %vm2534_vm10 = vcmp.gt.f32.partialorder %v2530_v37, 0.0  ;;  %v2546_v52 = vld [vmem:[%s5438_s4] sm:$0xff]  ;;  %s3678_s4 = smov [#allocation6]  }
 0x392   :  { %v2520_v47 = vpop.f32.mrf.mxu0  ;;  %s2723_s7 = sshll.u32 %s3678_s4, 4  ;;  %s2724_s7 = int_to_ptr.vmem [resolvable:$true] %s2723_s7 }
 0x393   :  { %v2532_v53 = vadd.f32 %v2526_v0, %v5118_v63  ;;  %v2521_v19 = vadd.f32 %v3213_v49, %v2520_v47  ;;  %v2538_v6 = vmul.f32 %v2537_v32, %v2529_v2  ;;  %vm2533_vm4 = vcmp.gt.f32.partialorder %v2529_v2, 0.0  ;;  %s3650_s12 = scalar_lea.vmem %s2724_s7, 16  ;;  %s3654_s13 = scalar_lea.vmem %s2724_s7, 32 }
 0x394   :  { %v2543_v40 = vsel %vm2534_vm10, %v2530_v37, %v2539_v57  ;;  %p3651_p5 = scmp.ne.s32.totalorder %s2724_s7, %s3650_s12  ;;  %p3655_p6 = scmp.lt.s32.totalorder %s2724_s7, %s2724_s7 }
 0x395   :  { %v2541_v60 = vmul.f32 %v2537_v32, %v2532_v53  ;;  %v2531_v59 = vadd.f32 %v2521_v19, %v5120_v12  ;;  %vm2536_vm1 = vcmp.gt.f32.partialorder %v2532_v53, 0.0  ;;  %v2542_v63 = vsel %vm2533_vm4, %v2529_v2, %v2538_v6  ;;  %v2551_v12 = vpop.permute.xlu0 %2550  ;;  %p3656_p7 = scmp.lt.s32.totalorder %s3654_s13, %s3650_s12 }
 0x397   :  { %v2540_v18 = vmul.f32 %v2537_v32, %v2531_v59  ;;  %v2545_v56 = vsel %vm2536_vm1, %v2532_v53, %v2541_v60  ;;  %vm2535_vm9 = vcmp.gt.f32.partialorder %v2531_v59, 0.0  ;;  %p3657_p8 = por %p3656_p7, %p3655_p6 }
 0x398   :  { %3611 = vmatpush3.msra.mxu0 %v2545_v56 }
 0x399   :  { %3612 = vmatprep.subr.mxu0 %v3675_v31  ;;  %v2544_v35 = vsel %vm2535_vm9, %v2531_v59, %v2540_v18  ;;  %v2636_v33 = vpop.permute.xlu0 %2635  ;;  %p3658_p9 = pnand %p3657_p8, %p3651_p5 }
 0x39a   :  { %3613 = vmatpush3.msra.mxu0 %v2544_v35  ;;  %v2641_v20 = vrot.slane %v2636_v33, %v2640_v61 }
 0x39b   :  { %3614 = vmatprep.subr.mxu0 %v3675_v31 }
 0x39c   :  { %3615 = vmatpush3.msra.mxu0 %v2543_v40 }
 0x39d   :  { %3616 = vmatprep.subr.mxu0 %v3675_v31 }
 0x39e   :  { %3617 = vmatpush3.msra.mxu0 %v2542_v63 }
 0x39f   :  { %3619 = vmatmul.mubr.msk.f32.vlgmr.msra.gmra.mxu0 %vm2553_vm5, %v2546_v52  ;;  %3621 = vmatprep.subr.mxu0 %v3675_v31 }
 0x3a0   :  { %3623 = vmatprep.mubr.msk.f32.mxu0 %vm3676_vm0, %v3675_v31 }
 0x45f   :  { %v2623_v8 = vpop.f32.mrf.mxu0 }
 0x460   :  { %v2624_v34 = vadd.f32 %v2623_v8, %v2551_v12 }
 0x461   :  { %v3620_v38 = vpop.f32.mrf.mxu0 }
 0x462   :  { %vm2627_vm6 = vcmp.gt.f32.partialorder %v2624_v34, 0.0  ;;  %v2629_v15 = vmul.f32 %v2628_v17, %v2624_v34 }
 0x464   :  { %v2630_v25 = vsel %vm2627_vm6, %v2624_v34, %v2629_v15 }
 0x465   :  { %3622 = vmatpush3.msra.mxu0 %v2630_v25 }
 0x466   :  { %3624 = vmatmul.mubr.msk.f32.vlgmr.msra.gmra.mxu0 %vm2642_vm15, %v2631_v10 }
 0x526   :  { %v2712_v58 = vpop.f32.mrf.mxu0 }
 0x527   :  { %v2713_v30 = vadd.f32 %v2712_v58, %v2641_v20 }
 0x528   :  { %v3625_v44 = vpop.f32.mrf.mxu0 }
 0x529   :  { %2716 = vst [vmem:[#allocation6] sm:$0x1] %v2713_v30 }
 0x52a   :  { %3661 = shalt.err (!%p3658_p9)
}
 0x52b   :  { %2726 = dma.vmem_to_hbm [thread:$0]  %s2724_s7, 16, %s5442_s8, [#allocation4]  }
 0x52c   :  { %3672 = dma.done.wait [#allocation4], 16  }
 0x52d   :  { %3673 = vsyncadd [#allocation4], 4294967280 }
 0x52e   :  { %2730 = vsyncpa [#allocation4], 1 }
 0x52f   :  { %2731 = vsyncpa [#allocation5], 1 }

</bundles_post_ra>
